<compile_context>
chip_gen: v6e
topology: v6e:2x2x1
jax: 0.10.0
libtpu: 0.0.40
codegen_flags: <defaults>
</compile_context>

<pallas_src>
import functools

import jax
import jax.numpy as jnp
from jax import lax
from jax.experimental import pallas as pl
from jax.experimental.pallas import tpu as pltpu

_BN_EPS = 1e-5
_LANE = 128
_SUB = 8
_MAX_TILE_M = 2048                 # lane-axis tile cap (multiple of 128)
_ACT_DTYPE = jnp.bfloat16          # GEMM operands + inter-layer activations
_VMEM_TILE_BUDGET = 24 * 1024 * 1024  # VMEM bytes allowed for pipelined blocks


def _round_up(x, m):
    return (x + m - 1) // m * m


# -----------------------------------------------------------------------------
# Kernel A: fused 4-phase sub-pixel deconv GEMM + per-tile BN partial statistics.
# -----------------------------------------------------------------------------
def _stats_kernel(x_ref, w_ref, s_ref):
    # x_ref: (4*Cin_p, TM) bf16  -- rows = [x00 | x01 | x10 | x11] channel blocks
    # w_ref: (4*Cout_p, 4*Cin_p) bf16 -- phase-major stacked weight
    # s_ref: (1, 2, 4*Cout_p) f32 -- this tile's [sum, sum of squares], lane-dense
    y = jnp.dot(w_ref[...], x_ref[...], preferred_element_type=jnp.float32)
    s_ref[0] = jnp.stack([jnp.sum(y, axis=1), jnp.sum(y * y, axis=1)])


# -----------------------------------------------------------------------------
# Kernel B: fused 4-phase deconv GEMM + folded BN affine (scale/shift) + ReLU.
# -----------------------------------------------------------------------------
def _deconv_affine_relu_kernel(x_ref, w_ref, a_ref, o_ref):
    # a_ref: (2, 4*Cout_p, 1) f32 = [scale, shift] (BN stats / gamma / beta folded)
    # o_ref: (4*Cout_p, TM) bf16
    y = jnp.dot(w_ref[...], x_ref[...], preferred_element_type=jnp.float32)
    o_ref[...] = jnp.maximum(y * a_ref[0] + a_ref[1], 0.0).astype(o_ref.dtype)


# -----------------------------------------------------------------------------
# Sub-pixel weight construction.
#
# ConvTranspose2d(k=3, s=2, p=1, op=1): output pixel (2a+i, 2b+j) only sees the
# input pixels x[a,b], x[a,b+1], x[a+1,b], x[a+1,b+1] with a phase-dependent
# subset of the 3x3 taps.  Phase p = 2*i + j.
# -----------------------------------------------------------------------------
def _phase_weights(weight, cin_p, cout_p):
    """PyTorch (Cin, Cout, 3, 3) weight -> stacked (4*Cout_p, 4*Cin_p) matrix.

    Output rows are phase-major: row r = p*Cout_p + c.  The 4 column blocks
    multiply the shifted views [x00 | x01 | x10 | x11].
    """
    cin, cout = weight.shape[0], weight.shape[1]
    wp = jnp.zeros((cin_p, cout_p, 3, 3), weight.dtype).at[:cin, :cout].set(weight)
    wt = lambda kh, kw: wp[:, :, kh, kw].T          # (Cout_p, Cin_p)
    z = jnp.zeros((cout_p, cin_p), weight.dtype)
    w_ee = jnp.concatenate([wt(1, 1), z,        z,        z       ], axis=1)
    w_eo = jnp.concatenate([wt(1, 2), wt(1, 0), z,        z       ], axis=1)
    w_oe = jnp.concatenate([wt(2, 1), z,        wt(0, 1), z       ], axis=1)
    w_oo = jnp.concatenate([wt(2, 2), wt(2, 0), wt(0, 2), wt(0, 0)], axis=1)
    return jnp.concatenate([w_ee, w_eo, w_oe, w_oo], axis=0)


def _choose_tile(M, cin_p, cout_p):
    """Pick the lane-axis tile from a VMEM budget; prefer >= 2 grid steps."""
    m_lanes = _round_up(M, _LANE)
    # Per-column VMEM: double-buffered bf16 input + bf16 output blocks + f32 GEMM temp.
    per_col = 2 * (4 * cin_p) * 2 + 2 * (4 * cout_p) * 2 + (4 * cout_p) * 4
    cap = max(_LANE, (_VMEM_TILE_BUDGET // per_col) // _LANE * _LANE)
    tile_m = min(_MAX_TILE_M, cap, m_lanes)
    # >= 2 grid steps when possible: shards the "parallel" axis across v7x's two
    # TensorCores and gives the BlockSpec pipeline something to overlap.
    if tile_m >= m_lanes and m_lanes >= 2 * _LANE:
        tile_m = _round_up((m_lanes + 1) // 2, _LANE)
    m_pad = _round_up(M, tile_m)
    return tile_m, m_pad, m_pad // tile_m


def deconv_bn_relu_cm(x_cm, weight, bias, gamma, beta):
    """One deconv_layer() block on a channel-major activation.

    x_cm: (Cin, N, H, W) float.  Returns (Cout, N, 2H, 2W) bf16.
    """
    del bias  # ConvTranspose2d bias cancels against the BN batch mean (training mode).
    Cin, N, H, W = x_cm.shape
    Cout = weight.shape[1]
    Cin_p = _round_up(Cin, _SUB)
    Cout_p = _round_up(Cout, _SUB)
    M = N * H * W
    tile_m, M_pad, n_tiles = _choose_tile(M, Cin_p, Cout_p)
    K = 4 * Cin_p
    R = 4 * Cout_p

    # ---- layout glue (bf16): pad channels, build the 4 shifted views ---------
    xc = x_cm.astype(_ACT_DTYPE)
    if Cin_p != Cin:
        xc = jnp.pad(xc, ((0, Cin_p - Cin), (0, 0), (0, 0), (0, 0)))
    xp = jnp.pad(xc, ((0, 0), (0, 0), (0, 1), (0, 1)))       # (Cin_p, N, H+1, W+1)
    x00 = xp[:, :, :H, :W]
    x01 = xp[:, :, :H, 1:]
    x10 = xp[:, :, 1:, :W]
    x11 = xp[:, :, 1:, 1:]
    x4 = jnp.concatenate([x00, x01, x10, x11], axis=0).reshape(K, M)
    if M_pad != M:
        x4 = jnp.pad(x4, ((0, 0), (0, M_pad - M)))           # zero cols: no stats effect

    wm = _phase_weights(weight, Cin_p, Cout_p).astype(_ACT_DTYPE)

    x_bytes = K * M_pad * 2
    w_bytes = R * K * 2
    flops = 2 * R * K * M_pad
    vmem_need = (2 * K * tile_m * 2 + 2 * R * tile_m * 2 + R * tile_m * 4
                 + 2 * w_bytes + 8 * R)
    vmem_limit = int(min(max(vmem_need * 3 // 2, 32 << 20), 48 << 20))
    cparams = pltpu.CompilerParams(
        dimension_semantics=("parallel",), vmem_limit_bytes=vmem_limit)

    # ---- pass 1: fused phase GEMM + per-tile BN partial statistics -----------
    stats = pl.pallas_call(
        _stats_kernel,
        out_shape=jax.ShapeDtypeStruct((n_tiles, 2, R), jnp.float32),
        grid=(n_tiles,),
        in_specs=[
            pl.BlockSpec((K, tile_m), lambda t: (0, t)),
            pl.BlockSpec((R, K), lambda t: (0, 0)),
        ],
        out_specs=pl.BlockSpec((1, 2, R), lambda t: (t, 0, 0)),
        compiler_params=cparams,
        cost_estimate=pl.CostEstimate(
            flops=flops, transcendentals=0,
            bytes_accessed=x_bytes + n_tiles * w_bytes + n_tiles * 2 * R * 4),
    )(x4, wm)

    # Combine per-tile [sum, sumsq] over tiles and over the 4 output phases.
    tot = stats.sum(axis=0).reshape(2, 4, Cout_p).sum(axis=1)   # (2, Cout_p)
    count = jnp.asarray(4 * M, jnp.float32)                     # N * (2H) * (2W)
    mean = tot[0] / count
    var = jnp.maximum(tot[1] / count - mean * mean, 0.0)
    # TODO(synk): E[y^2]-E[y]^2 in f32 is mildly cancellation-prone; switch to a
    # shifted/Welford combine if tighter tolerances are ever needed.

    gamma_p = jnp.zeros((Cout_p,), jnp.float32).at[:Cout].set(gamma)
    beta_p = jnp.zeros((Cout_p,), jnp.float32).at[:Cout].set(beta)
    scale = gamma_p * lax.rsqrt(var + _BN_EPS)
    shift = beta_p - scale * mean              # conv bias cancels with batch mean
    affine = jnp.stack([jnp.tile(scale, 4), jnp.tile(shift, 4)]).reshape(2, R, 1)

    # ---- pass 2: GEMM recompute + folded affine + ReLU, bf16 output ----------
    out = pl.pallas_call(
        _deconv_affine_relu_kernel,
        out_shape=jax.ShapeDtypeStruct((R, M_pad), _ACT_DTYPE),
        grid=(n_tiles,),
        in_specs=[
            pl.BlockSpec((K, tile_m), lambda t: (0, t)),
            pl.BlockSpec((R, K), lambda t: (0, 0)),
            pl.BlockSpec((2, R, 1), lambda t: (0, 0, 0)),
        ],
        out_specs=pl.BlockSpec((R, tile_m), lambda t: (0, t)),
        compiler_params=cparams,
        cost_estimate=pl.CostEstimate(
            flops=flops, transcendentals=0,
            bytes_accessed=x_bytes + n_tiles * (w_bytes + 2 * R * 4) + R * M_pad * 2),
    )(x4, wm, affine)

    # ---- layout glue: interleave the 4 output phases back to spatial (bf16) --
    # TODO(synk): phase-major chaining between layers would delete this transpose
    # and the next layer's shifted-view rebuild.
    out = out.reshape(4, Cout_p, M_pad)[:, :Cout, :M].reshape(2, 2, Cout, N, H, W)
    out = out.transpose(2, 3, 4, 0, 5, 1).reshape(Cout, N, 2 * H, 2 * W)
    return out


def init_motion_decoder(key, deconv_channels):
    """Deterministic synthetic parameters matching Motion_decoder.__init__ shapes."""
    pairs = [(deconv_channels[0], deconv_channels[1]),
             (deconv_channels[1], deconv_channels[2])]
    names = ["deconv1", "deconv2"]
    if len(deconv_channels) == 4:
        pairs.append((deconv_channels[2], deconv_channels[3]))
        names.append("deconv3")
    pairs.append((deconv_channels[-1], 3))
    names.append("deconvRecon")

    params = {}
    for name, (cin, cout) in zip(names, pairs):
        key, kw, kb, kg, kbt = jax.random.split(key, 5)
        params[name] = dict(
            weight=0.1 * jax.random.normal(kw, (cin, cout, 3, 3), jnp.float32),
            bias=0.1 * jax.random.normal(kb, (cout,), jnp.float32),
            gamma=1.0 + 0.1 * jax.random.normal(kg, (cout,), jnp.float32),
            beta=0.1 * jax.random.normal(kbt, (cout,), jnp.float32),
        )
    return params


def motion_decoder_forward(params, x, training=True):
    # NCHW -> channel-major (C, N, H, W); stay channel-major bf16 between layers.
    x_cm = x.transpose(1, 0, 2, 3)
    x_cm = deconv_bn_relu_cm(x_cm, **params["deconv1"])
    x_cm = deconv_bn_relu_cm(x_cm, **params["deconv2"])
    if "deconv3" in params:
        x_cm = deconv_bn_relu_cm(x_cm, **params["deconv3"])
    feat = x_cm.transpose(1, 0, 2, 3).astype(jnp.float32)
    if training:
        img_cm = deconv_bn_relu_cm(x_cm, **params["deconvRecon"])
        return feat, img_cm.transpose(1, 0, 2, 3).astype(jnp.float32)
    return feat


# ---------------- pure-JAX reference (for correctness check only) ----------------
def _ref_layer(x, weight, bias, gamma, beta):
    rhs = jnp.flip(weight, axis=(2, 3)).transpose(1, 0, 2, 3)  # (Cout, Cin, 3, 3)
    y = lax.conv_general_dilated(
        x, rhs, window_strides=(1, 1), padding=((1, 2), (1, 2)),
        lhs_dilation=(2, 2), dimension_numbers=("NCHW", "OIHW", "NCHW"))
    y = y + bias[None, :, None, None]
    mean = y.mean(axis=(0, 2, 3), keepdims=True)
    var = ((y - mean) ** 2).mean(axis=(0, 2, 3), keepdims=True)
    z = (y - mean) * lax.rsqrt(var + _BN_EPS)
    z = z * gamma[None, :, None, None] + beta[None, :, None, None]
    return jnp.maximum(z, 0.0)


def _ref_forward(params, x):
    x = _ref_layer(x, **params["deconv1"])
    x = _ref_layer(x, **params["deconv2"])
    if "deconv3" in params:
        x = _ref_layer(x, **params["deconv3"])
    return x, _ref_layer(x, **params["deconvRecon"])


if __name__ == "__main__":
    key = jax.random.PRNGKey(0)
    deconv_channels = [8, 8, 8, 8]          # len 4 -> deconv3 is present
    params = init_motion_decoder(key, deconv_channels)

    kx = jax.random.fold_in(key, 123)
    x = jax.random.normal(kx, (2, deconv_channels[0], 4, 4), jnp.float32)  # NCHW

    fwd = jax.jit(functools.partial(motion_decoder_forward, training=True))
    feat, motion_image = fwd(params, x)
    jax.block_until_ready((feat, motion_image))

    assert feat.shape == (2, deconv_channels[-1], 32, 32), feat.shape
    assert motion_image.shape == (2, 3, 64, 64), motion_image.shape

    # Tolerance accounts for bf16 MXU operands / bf16 inter-layer activations
    # accumulated & normalized in f32 across 4 chained layers (reference is f32).
    ref_feat, ref_img = _ref_forward(params, x)
    assert jnp.allclose(feat, ref_feat, atol=8e-2, rtol=8e-2), "feature mismatch"
    assert jnp.allclose(motion_image, ref_img, atol=8e-2, rtol=8e-2), "image mismatch"

    print("KERNEL_OK")
</pallas_src>

<mosaic_0001>
module attributes {stable_mosaic.version = 11 : i64} {
  func.func @_stats_kernel(%arg0: i32, %arg1: memref<32x128xbf16, #tpu.memory_space<vmem>>, %arg2: memref<32x32xbf16, #tpu.memory_space<vmem>>, %arg3: memref<1x2x32xf32, #tpu.memory_space<vmem>>) attributes {dimension_semantics = [#tpu.dimension_semantics<parallel>], iteration_bounds = array<i64: 1>, scalar_prefetch = 0 : i64, scratch_operands = 0 : i64, tpu.core_type = #tpu.core_type<tc>, window_params = [{transform_indices = @transform_0, window_bounds = array<i64: 32, 128>}, {pipeline_mode = #tpu.pipeline_mode<synchronous>, transform_indices = @transform_1, window_bounds = array<i64: 32, 32>}, {transform_indices = @transform_2, window_bounds = array<i64: 1, 2, 32>}]} {
    %c0 = arith.constant 0 : index
    %c0_0 = arith.constant 0 : index
    %0 = vector.load %arg2[%c0, %c0_0] : memref<32x32xbf16, #tpu.memory_space<vmem>>, vector<32x32xbf16>
    %c0_1 = arith.constant 0 : index
    %c0_2 = arith.constant 0 : index
    %1 = vector.load %arg1[%c0_1, %c0_2] : memref<32x128xbf16, #tpu.memory_space<vmem>>, vector<32x128xbf16>
    %cst = arith.constant dense<0.000000e+00> : vector<32x128xf32>
    %2 = tpu.matmul %0, %1, %cst {dimension_numbers = #tpu.dot_dimension_numbers<[1], [0], [0], [1], [0, 0, 1, 1], [], []>} : vector<32x32xbf16>, vector<32x128xbf16>, vector<32x128xf32> -> vector<32x128xf32>
    %cst_3 = arith.constant dense<0.000000e+00> : vector<32xf32>
    %3 = vector.multi_reduction <add>, %2, %cst_3 [1] : vector<32x128xf32> to vector<32xf32>
    %4 = arith.mulf %2, %2 : vector<32x128xf32>
    %cst_4 = arith.constant dense<0.000000e+00> : vector<32xf32>
    %5 = vector.multi_reduction <add>, %4, %cst_4 [1] : vector<32x128xf32> to vector<32xf32>
    %6 = vector.shape_cast %3 : vector<32xf32> to vector<1x32xf32>
    %7 = vector.shape_cast %5 : vector<32xf32> to vector<1x32xf32>
    %8 = tpu.concatenate %6, %7 in 0 : vector<1x32xf32>, vector<1x32xf32> -> vector<2x32xf32>
    %c0_5 = arith.constant 0 : index
    %c0_6 = arith.constant 0 : index
    %c0_7 = arith.constant 0 : index
    %9 = vector.load %arg3[%c0_5, %c0_6, %c0_7] : memref<1x2x32xf32, #tpu.memory_space<vmem>>, vector<1x2x32xf32>
    %10 = vector.shape_cast %9 : vector<1x2x32xf32> to vector<2x32xf32>
    %11 = vector.shape_cast %8 : vector<2x32xf32> to vector<1x2x32xf32>
    tpu.vector_store %arg3[%c0_5, %c0_6, %c0_7], %11 {strides = array<i32>} : memref<1x2x32xf32, #tpu.memory_space<vmem>>, vector<1x2x32xf32>,
    return
  }
  func.func @transform_0(%arg0: i32) -> (i32, i32) {
    %c0_i32 = arith.constant 0 : i32
    %c0_i32_0 = arith.constant 0 : i32
    return %c0_i32, %arg0 : i32, i32
  }
  func.func @transform_1(%arg0: i32) -> (i32, i32) {
    %c0_i32 = arith.constant 0 : i32
    %c0_i32_0 = arith.constant 0 : i32
    %c0_i32_1 = arith.constant 0 : i32
    return %c0_i32, %c0_i32_0 : i32, i32
  }
  func.func @transform_2(%arg0: i32) -> (i32, i32, i32) {
    %c0_i32 = arith.constant 0 : i32
    %c0_i32_0 = arith.constant 0 : i32
    %c0_i32_1 = arith.constant 0 : i32
    return %arg0, %c0_i32, %c0_i32_0 : i32, i32, i32
  }
}

module attributes {stable_mosaic.version = 11 : i64} {
  func.func @_deconv_affine_relu_kernel(%arg0: i32, %arg1: memref<32x128xbf16, #tpu.memory_space<vmem>>, %arg2: memref<32x32xbf16, #tpu.memory_space<vmem>>, %arg3: memref<2x32x1xf32, #tpu.memory_space<vmem>>, %arg4: memref<32x128xbf16, #tpu.memory_space<vmem>>) attributes {dimension_semantics = [#tpu.dimension_semantics<parallel>], iteration_bounds = array<i64: 1>, scalar_prefetch = 0 : i64, scratch_operands = 0 : i64, tpu.core_type = #tpu.core_type<tc>, window_params = [{transform_indices = @transform_0, window_bounds = array<i64: 32, 128>}, {pipeline_mode = #tpu.pipeline_mode<synchronous>, transform_indices = @transform_1, window_bounds = array<i64: 32, 32>}, {pipeline_mode = #tpu.pipeline_mode<synchronous>, transform_indices = @transform_2, window_bounds = array<i64: 2, 32, 1>}, {transform_indices = @transform_3, window_bounds = array<i64: 32, 128>}]} {
    %c0 = arith.constant 0 : index
    %c0_0 = arith.constant 0 : index
    %0 = vector.load %arg2[%c0, %c0_0] : memref<32x32xbf16, #tpu.memory_space<vmem>>, vector<32x32xbf16>
    %c0_1 = arith.constant 0 : index
    %c0_2 = arith.constant 0 : index
    %1 = vector.load %arg1[%c0_1, %c0_2] : memref<32x128xbf16, #tpu.memory_space<vmem>>, vector<32x128xbf16>
    %cst = arith.constant dense<0.000000e+00> : vector<32x128xf32>
    %2 = tpu.matmul %0, %1, %cst {dimension_numbers = #tpu.dot_dimension_numbers<[1], [0], [0], [1], [0, 0, 1, 1], [], []>} : vector<32x32xbf16>, vector<32x128xbf16>, vector<32x128xf32> -> vector<32x128xf32>
    %c0_3 = arith.constant 0 : index
    %c0_4 = arith.constant 0 : index
    %c0_5 = arith.constant 0 : index
    %3 = vector.load %arg3[%c0_3, %c0_4, %c0_5] : memref<2x32x1xf32, #tpu.memory_space<vmem>>, vector<1x32x1xf32>
    %4 = vector.shape_cast %3 : vector<1x32x1xf32> to vector<32x1xf32>
    %5 = vector.broadcast %4 : vector<32x1xf32> to vector<32x128xf32>
    %6 = arith.mulf %2, %5 : vector<32x128xf32>
    %c1 = arith.constant 1 : index
    %c0_6 = arith.constant 0 : index
    %c0_7 = arith.constant 0 : index
    %7 = vector.load %arg3[%c1, %c0_6, %c0_7] : memref<2x32x1xf32, #tpu.memory_space<vmem>>, vector<1x32x1xf32>
    %8 = vector.shape_cast %7 : vector<1x32x1xf32> to vector<32x1xf32>
    %9 = vector.broadcast %8 : vector<32x1xf32> to vector<32x128xf32>
    %10 = arith.addf %6, %9 : vector<32x128xf32>
    %cst_8 = arith.constant 0.000000e+00 : f32
    %11 = vector.broadcast %cst_8 : f32 to vector<32x128xf32>
    %12 = arith.maximumf %10, %11 : vector<32x128xf32>
    %13 = arith.truncf %12 : vector<32x128xf32> to vector<32x128xbf16>
    %c0_9 = arith.constant 0 : index
    %c0_10 = arith.constant 0 : index
    %14 = vector.load %arg4[%c0_9, %c0_10] : memref<32x128xbf16, #tpu.memory_space<vmem>>, vector<32x128xbf16>
    tpu.vector_store %arg4[%c0_9, %c0_10], %13 {strides = array<i32>} : memref<32x128xbf16, #tpu.memory_space<vmem>>, vector<32x128xbf16>,
    return
  }
  func.func @transform_0(%arg0: i32) -> (i32, i32) {
    %c0_i32 = arith.constant 0 : i32
    %c0_i32_0 = arith.constant 0 : i32
    return %c0_i32, %arg0 : i32, i32
  }
  func.func @transform_1(%arg0: i32) -> (i32, i32) {
    %c0_i32 = arith.constant 0 : i32
    %c0_i32_0 = arith.constant 0 : i32
    %c0_i32_1 = arith.constant 0 : i32
    return %c0_i32, %c0_i32_0 : i32, i32
  }
  func.func @transform_2(%arg0: i32) -> (i32, i32, i32) {
    %c0_i32 = arith.constant 0 : i32
    %c0_i32_0 = arith.constant 0 : i32
    %c0_i32_1 = arith.constant 0 : i32
    %c0_i32_2 = arith.constant 0 : i32
    return %c0_i32, %c0_i32_0, %c0_i32_1 : i32, i32, i32
  }
  func.func @transform_3(%arg0: i32) -> (i32, i32) {
    %c0_i32 = arith.constant 0 : i32
    %c0_i32_0 = arith.constant 0 : i32
    return %c0_i32, %arg0 : i32, i32
  }
}

module attributes {stable_mosaic.version = 11 : i64} {
  func.func @_stats_kernel(%arg0: i32, %arg1: memref<32x256xbf16, #tpu.memory_space<vmem>>, %arg2: memref<32x32xbf16, #tpu.memory_space<vmem>>, %arg3: memref<1x2x32xf32, #tpu.memory_space<vmem>>) attributes {dimension_semantics = [#tpu.dimension_semantics<parallel>], iteration_bounds = array<i64: 2>, scalar_prefetch = 0 : i64, scratch_operands = 0 : i64, tpu.core_type = #tpu.core_type<tc>, window_params = [{transform_indices = @transform_0, window_bounds = array<i64: 32, 256>}, {pipeline_mode = #tpu.pipeline_mode<synchronous>, transform_indices = @transform_1, window_bounds = array<i64: 32, 32>}, {transform_indices = @transform_2, window_bounds = array<i64: 1, 2, 32>}]} {
    %c0 = arith.constant 0 : index
    %c0_0 = arith.constant 0 : index
    %0 = vector.load %arg2[%c0, %c0_0] : memref<32x32xbf16, #tpu.memory_space<vmem>>, vector<32x32xbf16>
    %c0_1 = arith.constant 0 : index
    %c0_2 = arith.constant 0 : index
    %1 = vector.load %arg1[%c0_1, %c0_2] : memref<32x256xbf16, #tpu.memory_space<vmem>>, vector<32x256xbf16>
    %cst = arith.constant dense<0.000000e+00> : vector<32x256xf32>
    %2 = tpu.matmul %0, %1, %cst {dimension_numbers = #tpu.dot_dimension_numbers<[1], [0], [0], [1], [0, 0, 1, 1], [], []>} : vector<32x32xbf16>, vector<32x256xbf16>, vector<32x256xf32> -> vector<32x256xf32>
    %cst_3 = arith.constant dense<0.000000e+00> : vector<32xf32>
    %3 = vector.multi_reduction <add>, %2, %cst_3 [1] : vector<32x256xf32> to vector<32xf32>
    %4 = arith.mulf %2, %2 : vector<32x256xf32>
    %cst_4 = arith.constant dense<0.000000e+00> : vector<32xf32>
    %5 = vector.multi_reduction <add>, %4, %cst_4 [1] : vector<32x256xf32> to vector<32xf32>
    %6 = vector.shape_cast %3 : vector<32xf32> to vector<1x32xf32>
    %7 = vector.shape_cast %5 : vector<32xf32> to vector<1x32xf32>
    %8 = tpu.concatenate %6, %7 in 0 : vector<1x32xf32>, vector<1x32xf32> -> vector<2x32xf32>
    %c0_5 = arith.constant 0 : index
    %c0_6 = arith.constant 0 : index
    %c0_7 = arith.constant 0 : index
    %9 = vector.load %arg3[%c0_5, %c0_6, %c0_7] : memref<1x2x32xf32, #tpu.memory_space<vmem>>, vector<1x2x32xf32>
    %10 = vector.shape_cast %9 : vector<1x2x32xf32> to vector<2x32xf32>
    %11 = vector.shape_cast %8 : vector<2x32xf32> to vector<1x2x32xf32>
    tpu.vector_store %arg3[%c0_5, %c0_6, %c0_7], %11 {strides = array<i32>} : memref<1x2x32xf32, #tpu.memory_space<vmem>>, vector<1x2x32xf32>,
    return
  }
  func.func @transform_0(%arg0: i32) -> (i32, i32) {
    %c0_i32 = arith.constant 0 : i32
    %c0_i32_0 = arith.constant 0 : i32
    return %c0_i32, %arg0 : i32, i32
  }
  func.func @transform_1(%arg0: i32) -> (i32, i32) {
    %c0_i32 = arith.constant 0 : i32
    %c0_i32_0 = arith.constant 0 : i32
    %c0_i32_1 = arith.constant 0 : i32
    return %c0_i32, %c0_i32_0 : i32, i32
  }
  func.func @transform_2(%arg0: i32) -> (i32, i32, i32) {
    %c0_i32 = arith.constant 0 : i32
    %c0_i32_0 = arith.constant 0 : i32
    %c0_i32_1 = arith.constant 0 : i32
    return %arg0, %c0_i32, %c0_i32_0 : i32, i32, i32
  }
}

module attributes {stable_mosaic.version = 11 : i64} {
  func.func @_deconv_affine_relu_kernel(%arg0: i32, %arg1: memref<32x256xbf16, #tpu.memory_space<vmem>>, %arg2: memref<32x32xbf16, #tpu.memory_space<vmem>>, %arg3: memref<2x32x1xf32, #tpu.memory_space<vmem>>, %arg4: memref<32x256xbf16, #tpu.memory_space<vmem>>) attributes {dimension_semantics = [#tpu.dimension_semantics<parallel>], iteration_bounds = array<i64: 2>, scalar_prefetch = 0 : i64, scratch_operands = 0 : i64, tpu.core_type = #tpu.core_type<tc>, window_params = [{transform_indices = @transform_0, window_bounds = array<i64: 32, 256>}, {pipeline_mode = #tpu.pipeline_mode<synchronous>, transform_indices = @transform_1, window_bounds = array<i64: 32, 32>}, {pipeline_mode = #tpu.pipeline_mode<synchronous>, transform_indices = @transform_2, window_bounds = array<i64: 2, 32, 1>}, {transform_indices = @transform_3, window_bounds = array<i64: 32, 256>}]} {
    %c0 = arith.constant 0 : index
    %c0_0 = arith.constant 0 : index
    %0 = vector.load %arg2[%c0, %c0_0] : memref<32x32xbf16, #tpu.memory_space<vmem>>, vector<32x32xbf16>
    %c0_1 = arith.constant 0 : index
    %c0_2 = arith.constant 0 : index
    %1 = vector.load %arg1[%c0_1, %c0_2] : memref<32x256xbf16, #tpu.memory_space<vmem>>, vector<32x256xbf16>
    %cst = arith.constant dense<0.000000e+00> : vector<32x256xf32>
    %2 = tpu.matmul %0, %1, %cst {dimension_numbers = #tpu.dot_dimension_numbers<[1], [0], [0], [1], [0, 0, 1, 1], [], []>} : vector<32x32xbf16>, vector<32x256xbf16>, vector<32x256xf32> -> vector<32x256xf32>
    %c0_3 = arith.constant 0 : index
    %c0_4 = arith.constant 0 : index
    %c0_5 = arith.constant 0 : index
    %3 = vector.load %arg3[%c0_3, %c0_4, %c0_5] : memref<2x32x1xf32, #tpu.memory_space<vmem>>, vector<1x32x1xf32>
    %4 = vector.shape_cast %3 : vector<1x32x1xf32> to vector<32x1xf32>
    %5 = vector.broadcast %4 : vector<32x1xf32> to vector<32x256xf32>
    %6 = arith.mulf %2, %5 : vector<32x256xf32>
    %c1 = arith.constant 1 : index
    %c0_6 = arith.constant 0 : index
    %c0_7 = arith.constant 0 : index
    %7 = vector.load %arg3[%c1, %c0_6, %c0_7] : memref<2x32x1xf32, #tpu.memory_space<vmem>>, vector<1x32x1xf32>
    %8 = vector.shape_cast %7 : vector<1x32x1xf32> to vector<32x1xf32>
    %9 = vector.broadcast %8 : vector<32x1xf32> to vector<32x256xf32>
    %10 = arith.addf %6, %9 : vector<32x256xf32>
    %cst_8 = arith.constant 0.000000e+00 : f32
    %11 = vector.broadcast %cst_8 : f32 to vector<32x256xf32>
    %12 = arith.maximumf %10, %11 : vector<32x256xf32>
    %13 = arith.truncf %12 : vector<32x256xf32> to vector<32x256xbf16>
    %c0_9 = arith.constant 0 : index
    %c0_10 = arith.constant 0 : index
    %14 = vector.load %arg4[%c0_9, %c0_10] : memref<32x256xbf16, #tpu.memory_space<vmem>>, vector<32x256xbf16>
    tpu.vector_store %arg4[%c0_9, %c0_10], %13 {strides = array<i32>} : memref<32x256xbf16, #tpu.memory_space<vmem>>, vector<32x256xbf16>,
    return
  }
  func.func @transform_0(%arg0: i32) -> (i32, i32) {
    %c0_i32 = arith.constant 0 : i32
    %c0_i32_0 = arith.constant 0 : i32
    return %c0_i32, %arg0 : i32, i32
  }
  func.func @transform_1(%arg0: i32) -> (i32, i32) {
    %c0_i32 = arith.constant 0 : i32
    %c0_i32_0 = arith.constant 0 : i32
    %c0_i32_1 = arith.constant 0 : i32
    return %c0_i32, %c0_i32_0 : i32, i32
  }
  func.func @transform_2(%arg0: i32) -> (i32, i32, i32) {
    %c0_i32 = arith.constant 0 : i32
    %c0_i32_0 = arith.constant 0 : i32
    %c0_i32_1 = arith.constant 0 : i32
    %c0_i32_2 = arith.constant 0 : i32
    return %c0_i32, %c0_i32_0, %c0_i32_1 : i32, i32, i32
  }
  func.func @transform_3(%arg0: i32) -> (i32, i32) {
    %c0_i32 = arith.constant 0 : i32
    %c0_i32_0 = arith.constant 0 : i32
    return %c0_i32, %arg0 : i32, i32
  }
}

module attributes {stable_mosaic.version = 11 : i64} {
  func.func @_stats_kernel(%arg0: i32, %arg1: memref<32x1024xbf16, #tpu.memory_space<vmem>>, %arg2: memref<32x32xbf16, #tpu.memory_space<vmem>>, %arg3: memref<1x2x32xf32, #tpu.memory_space<vmem>>) attributes {dimension_semantics = [#tpu.dimension_semantics<parallel>], iteration_bounds = array<i64: 2>, scalar_prefetch = 0 : i64, scratch_operands = 0 : i64, tpu.core_type = #tpu.core_type<tc>, window_params = [{transform_indices = @transform_0, window_bounds = array<i64: 32, 1024>}, {pipeline_mode = #tpu.pipeline_mode<synchronous>, transform_indices = @transform_1, window_bounds = array<i64: 32, 32>}, {transform_indices = @transform_2, window_bounds = array<i64: 1, 2, 32>}]} {
    %c0 = arith.constant 0 : index
    %c0_0 = arith.constant 0 : index
    %0 = vector.load %arg2[%c0, %c0_0] : memref<32x32xbf16, #tpu.memory_space<vmem>>, vector<32x32xbf16>
    %c0_1 = arith.constant 0 : index
    %c0_2 = arith.constant 0 : index
    %1 = vector.load %arg1[%c0_1, %c0_2] : memref<32x1024xbf16, #tpu.memory_space<vmem>>, vector<32x1024xbf16>
    %cst = arith.constant dense<0.000000e+00> : vector<32x1024xf32>
    %2 = tpu.matmul %0, %1, %cst {dimension_numbers = #tpu.dot_dimension_numbers<[1], [0], [0], [1], [0, 0, 1, 1], [], []>} : vector<32x32xbf16>, vector<32x1024xbf16>, vector<32x1024xf32> -> vector<32x1024xf32>
    %cst_3 = arith.constant dense<0.000000e+00> : vector<32xf32>
    %3 = vector.multi_reduction <add>, %2, %cst_3 [1] : vector<32x1024xf32> to vector<32xf32>
    %4 = arith.mulf %2, %2 : vector<32x1024xf32>
    %cst_4 = arith.constant dense<0.000000e+00> : vector<32xf32>
    %5 = vector.multi_reduction <add>, %4, %cst_4 [1] : vector<32x1024xf32> to vector<32xf32>
    %6 = vector.shape_cast %3 : vector<32xf32> to vector<1x32xf32>
    %7 = vector.shape_cast %5 : vector<32xf32> to vector<1x32xf32>
    %8 = tpu.concatenate %6, %7 in 0 : vector<1x32xf32>, vector<1x32xf32> -> vector<2x32xf32>
    %c0_5 = arith.constant 0 : index
    %c0_6 = arith.constant 0 : index
    %c0_7 = arith.constant 0 : index
    %9 = vector.load %arg3[%c0_5, %c0_6, %c0_7] : memref<1x2x32xf32, #tpu.memory_space<vmem>>, vector<1x2x32xf32>
    %10 = vector.shape_cast %9 : vector<1x2x32xf32> to vector<2x32xf32>
    %11 = vector.shape_cast %8 : vector<2x32xf32> to vector<1x2x32xf32>
    tpu.vector_store %arg3[%c0_5, %c0_6, %c0_7], %11 {strides = array<i32>} : memref<1x2x32xf32, #tpu.memory_space<vmem>>, vector<1x2x32xf32>,
    return
  }
  func.func @transform_0(%arg0: i32) -> (i32, i32) {
    %c0_i32 = arith.constant 0 : i32
    %c0_i32_0 = arith.constant 0 : i32
    return %c0_i32, %arg0 : i32, i32
  }
  func.func @transform_1(%arg0: i32) -> (i32, i32) {
    %c0_i32 = arith.constant 0 : i32
    %c0_i32_0 = arith.constant 0 : i32
    %c0_i32_1 = arith.constant 0 : i32
    return %c0_i32, %c0_i32_0 : i32, i32
  }
  func.func @transform_2(%arg0: i32) -> (i32, i32, i32) {
    %c0_i32 = arith.constant 0 : i32
    %c0_i32_0 = arith.constant 0 : i32
    %c0_i32_1 = arith.constant 0 : i32
    return %arg0, %c0_i32, %c0_i32_0 : i32, i32, i32
  }
}

module attributes {stable_mosaic.version = 11 : i64} {
  func.func @_deconv_affine_relu_kernel(%arg0: i32, %arg1: memref<32x1024xbf16, #tpu.memory_space<vmem>>, %arg2: memref<32x32xbf16, #tpu.memory_space<vmem>>, %arg3: memref<2x32x1xf32, #tpu.memory_space<vmem>>, %arg4: memref<32x1024xbf16, #tpu.memory_space<vmem>>) attributes {dimension_semantics = [#tpu.dimension_semantics<parallel>], iteration_bounds = array<i64: 2>, scalar_prefetch = 0 : i64, scratch_operands = 0 : i64, tpu.core_type = #tpu.core_type<tc>, window_params = [{transform_indices = @transform_0, window_bounds = array<i64: 32, 1024>}, {pipeline_mode = #tpu.pipeline_mode<synchronous>, transform_indices = @transform_1, window_bounds = array<i64: 32, 32>}, {pipeline_mode = #tpu.pipeline_mode<synchronous>, transform_indices = @transform_2, window_bounds = array<i64: 2, 32, 1>}, {transform_indices = @transform_3, window_bounds = array<i64: 32, 1024>}]} {
    %c0 = arith.constant 0 : index
    %c0_0 = arith.constant 0 : index
    %0 = vector.load %arg2[%c0, %c0_0] : memref<32x32xbf16, #tpu.memory_space<vmem>>, vector<32x32xbf16>
    %c0_1 = arith.constant 0 : index
    %c0_2 = arith.constant 0 : index
    %1 = vector.load %arg1[%c0_1, %c0_2] : memref<32x1024xbf16, #tpu.memory_space<vmem>>, vector<32x1024xbf16>
    %cst = arith.constant dense<0.000000e+00> : vector<32x1024xf32>
    %2 = tpu.matmul %0, %1, %cst {dimension_numbers = #tpu.dot_dimension_numbers<[1], [0], [0], [1], [0, 0, 1, 1], [], []>} : vector<32x32xbf16>, vector<32x1024xbf16>, vector<32x1024xf32> -> vector<32x1024xf32>
    %c0_3 = arith.constant 0 : index
    %c0_4 = arith.constant 0 : index
    %c0_5 = arith.constant 0 : index
    %3 = vector.load %arg3[%c0_3, %c0_4, %c0_5] : memref<2x32x1xf32, #tpu.memory_space<vmem>>, vector<1x32x1xf32>
    %4 = vector.shape_cast %3 : vector<1x32x1xf32> to vector<32x1xf32>
    %5 = vector.broadcast %4 : vector<32x1xf32> to vector<32x1024xf32>
    %6 = arith.mulf %2, %5 : vector<32x1024xf32>
    %c1 = arith.constant 1 : index
    %c0_6 = arith.constant 0 : index
    %c0_7 = arith.constant 0 : index
    %7 = vector.load %arg3[%c1, %c0_6, %c0_7] : memref<2x32x1xf32, #tpu.memory_space<vmem>>, vector<1x32x1xf32>
    %8 = vector.shape_cast %7 : vector<1x32x1xf32> to vector<32x1xf32>
    %9 = vector.broadcast %8 : vector<32x1xf32> to vector<32x1024xf32>
    %10 = arith.addf %6, %9 : vector<32x1024xf32>
    %cst_8 = arith.constant 0.000000e+00 : f32
    %11 = vector.broadcast %cst_8 : f32 to vector<32x1024xf32>
    %12 = arith.maximumf %10, %11 : vector<32x1024xf32>
    %13 = arith.truncf %12 : vector<32x1024xf32> to vector<32x1024xbf16>
    %c0_9 = arith.constant 0 : index
    %c0_10 = arith.constant 0 : index
    %14 = vector.load %arg4[%c0_9, %c0_10] : memref<32x1024xbf16, #tpu.memory_space<vmem>>, vector<32x1024xbf16>
    tpu.vector_store %arg4[%c0_9, %c0_10], %13 {strides = array<i32>} : memref<32x1024xbf16, #tpu.memory_space<vmem>>, vector<32x1024xbf16>,
    return
  }
  func.func @transform_0(%arg0: i32) -> (i32, i32) {
    %c0_i32 = arith.constant 0 : i32
    %c0_i32_0 = arith.constant 0 : i32
    return %c0_i32, %arg0 : i32, i32
  }
  func.func @transform_1(%arg0: i32) -> (i32, i32) {
    %c0_i32 = arith.constant 0 : i32
    %c0_i32_0 = arith.constant 0 : i32
    %c0_i32_1 = arith.constant 0 : i32
    return %c0_i32, %c0_i32_0 : i32, i32
  }
  func.func @transform_2(%arg0: i32) -> (i32, i32, i32) {
    %c0_i32 = arith.constant 0 : i32
    %c0_i32_0 = arith.constant 0 : i32
    %c0_i32_1 = arith.constant 0 : i32
    %c0_i32_2 = arith.constant 0 : i32
    return %c0_i32, %c0_i32_0, %c0_i32_1 : i32, i32, i32
  }
  func.func @transform_3(%arg0: i32) -> (i32, i32) {
    %c0_i32 = arith.constant 0 : i32
    %c0_i32_0 = arith.constant 0 : i32
    return %c0_i32, %arg0 : i32, i32
  }
}

</mosaic_0001>

<bundles_post_ra>
// kernel: tile.47
= control target key start
LH: loop header
LB: loop body
LE: loop exit
PB: predicated region body
PF: predicated region fallthrough
CT: control target
= control target key end

     0   :  { %s22_s0 = inlined_call_operand.vmem [shape: f32[8], index: 0, kind: input, shape index: {}]   ;;  %s23_s1 = inlined_call_operand.vmem [shape: f32[4,8], index: 1, kind: output, shape index: {}]  }
   0x1   :  { %v4_v0 = vld [vmem:[%s22_s0] ss:$0 sm:$0xff] }
   0x2   :  { %5 = vst [vmem:[%s23_s1] sm:$0xf] %v4_v0 }

// kernel: tile.49
= control target key start
LH: loop header
LB: loop body
LE: loop exit
PB: predicated region body
PF: predicated region fallthrough
CT: control target
= control target key end

     0   :  { %vm8_vm0 = vcmask 64512   ;;  %s40_s8 = smov 8   ;;  %s41_s9 = smov 16   ;;  %vm14_vm1 = vcmask 261312   ;;  %vm20_vm2 = vcmask 195712   ;;  %vm26_vm3 = vcmask 130112   ;;  %s58_s0 = inlined_call_operand.vmem [shape: f32[4,8], index: 0, kind: input, shape index: {}]   ;;  %s59_s1 = inlined_call_operand.vmem [shape: f32[1,32], index: 1, kind: output, shape index: {}]  }
   0x1   :  { %v5_v0 = vld [vmem:[%s58_s0] sm:$0xf]  ;;  %s39_s0 = smov 24  }
   0x2   :  { %6 = vst [vmem:[#allocation1] sm:$0xf] %v5_v0 }
   0x9   :  { %v11_v1 = vld [vmem:[#allocation1 + $0x3] sm:$0x1]   ;;  %v23_v2 = vld [vmem:[#allocation1 + $0x1] sm:$0x1]   ;;  %v7_v3 = vld [vmem:[#allocation1] sm:$0x1]  }
   0xa   :  { %12 = vrot.lane.b32.xlu0 %v11_v1, %s39_s0  ;;  %24 = vrot.lane.b32.xlu1 %v23_v2, %s40_s8  ;;  %v17_v4 = vld [vmem:[#allocation1 + $0x2] sm:$0x1]   ;;  %9 = vst.msk [vmem:[#allocation0] sm:$0x1] %vm8_vm0, %v7_v3  }
   0xe   :  { %18 = vrot.lane.b32.xlu0 %v17_v4, %s41_s9 }
  0x7c   :  { %v13_v5 = vpop.permute.xlu0 %12   ;;  %v25_v6 = vpop.permute.xlu1 %24  }
  0x7d   :  { %15 = vst.msk [vmem:[#allocation0] sm:$0x1] %vm14_vm1, %v13_v5  }
  0x80   :  { %v19_v7 = vpop.permute.xlu0 %18  }
  0x81   :  { %21 = vst.msk [vmem:[#allocation0] sm:$0x1] %vm20_vm2, %v19_v7  }
  0x82   :  { %27 = vst.msk [vmem:[#allocation0] sm:$0x1] %vm26_vm3, %v25_v6  }
  0x89   :  { %v32_v8 = vld [vmem:[#allocation0] sm:$0x1] }
  0x8a   :  { %35 = vst [vmem:[%s59_s1] sm:$0x1] %v32_v8 }

// kernel: motion_decoder_forward.9
= control target key start
LH: loop header
LB: loop body
LE: loop exit
PB: predicated region body
PF: predicated region fallthrough
CT: control target
= control target key end

     0   :  { %v234_v1 = vmov 0   ;;  %vm45_vm0 = vcmask 261120   ;;  %s299_s0 = inlined_call_operand.vmem [shape: bf16[32,128], index: 0, kind: input, shape index: {}]   ;;  %s300_s1 = inlined_call_operand.vmem [shape: bf16[32,32], index: 1, kind: input, shape index: {}]   ;;  %s301_s2 = inlined_call_operand.vmem [shape: f32[2,32,1], index: 2, kind: input, shape index: {}]   ;;  %s302_s3 = inlined_call_operand.vmem [shape: bf16[32,128], index: 3, kind: output, shape index: {}]  }
   0x1   :  { %v230_v0 = vld [vmem:[%s299_s0 + $0x8] sm:$0xff]   ;;  %229 = vset.pattern.permute.xlu1 %v234_v1  ;;  %228 = vset.pattern.permute.xlu0 %v234_v1  ;;  %v231_v2 = vld [vmem:[%s299_s0] sm:$0xff]   ;;  %v103_v4 = vld [vmem:[%s301_s2 + $0x10] sm:$0xff] }
   0x2   :  { %219 = vmatprep.subr.bf16.mxu0 %v230_v0  ;;  %v232_v3 = vld [vmem:[%s300_s1] sm:$0xff]   ;;  %117 = vperm.xlu1 %229, %v103_v4   ;;  %v233_v6 = vld [vmem:[%s300_s1 + $0x8] sm:$0xff]   ;;  %v104_v7 = vld [vmem:[%s301_s2 + $0x18] sm:$0xff] }
   0x3   :  { %220 = vmatpush3.bf16.msra.mxu0 %v230_v0  ;;  %223 = vmatprep.mubr.msk.bf16.mxu0 %vm45_vm0, %v232_v3  ;;  %v101_v5 = vld [vmem:[%s301_s2] sm:$0xff]  ;;  %v102_v8 = vld [vmem:[%s301_s2 + $0x8] sm:$0xff]  ;;  %v195_v11 = vld [vmem:[%s301_s2 + $0x38] sm:$0xff] }
   0x4   :  { %221 = vmatprep.subr.bf16.mxu0 %v231_v2  ;;  %107 = vperm.xlu0 %228, %v101_v5   ;;  %v193_v9 = vld [vmem:[%s301_s2 + $0x28] sm:$0xff]  ;;  %v192_v10 = vld [vmem:[%s301_s2 + $0x20] sm:$0xff]  ;;  %v194_v12 = vld [vmem:[%s301_s2 + $0x30] sm:$0xff] }
   0x6   :  { %122 = vperm.xlu1 %229, %v104_v7  }
   0x7   :  { %222 = vmatpush3.bf16.msra.mxu0 %v231_v2 }
   0x8   :  { %112 = vperm.xlu0 %228, %v102_v8  }
   0xa   :  { %224 = vmatmul.mubr.msk.bf16.vlgmr.msra.gmra.mxu0 %vm45_vm0, %v233_v6  ;;  %141 = vperm.xlu1 %229, %v193_v9  }
   0xc   :  { %136 = vperm.xlu0 %228, %v192_v10  }
   0xe   :  { %151 = vperm.xlu1 %229, %v195_v11  }
  0x10   :  { %146 = vperm.xlu0 %228, %v194_v12  }
  0x7d   :  { %v118_v14 = vpop.permute.xlu1 %117 }
  0x7f   :  { %v108_v13 = vpop.permute.xlu0 %107 }
  0x81   :  { %v123_v16 = vpop.permute.xlu1 %122 }
  0x83   :  { %v113_v15 = vpop.permute.xlu0 %112 }
  0x85   :  { %v142_v18 = vpop.permute.xlu1 %141 }
  0x87   :  { %v137_v17 = vpop.permute.xlu0 %136 }
  0x89   :  { %v152_v27 = vpop.permute.xlu1 %151 }
  0x8b   :  { %v147_v23 = vpop.permute.xlu0 %146 }
  0xca   :  { %v225_v19 = vpop.f32.mrf.mxu0 }
  0xcb   :  { %v127_v20 = vmul.f32 %v225_v19, %v118_v14 }
  0xcc   :  { %v86_v21 = vpop.f32.mrf.mxu0 }
  0xcd   :  { %v125_v22 = vmul.f32 %v108_v13, %v86_v21  ;;  %v156_v25 = vadd.f32 %v147_v23, %v127_v20 }
  0xce   :  { %v226_v24 = vpop.f32.mrf.mxu0 }
  0xcf   :  { %v128_v26 = vmul.f32 %v226_v24, %v123_v16  ;;  %v154_v29 = vadd.f32 %v137_v17, %v125_v22  ;;  %v160_v32 = vmax.f32 %v156_v25, 0.0 }
  0xd0   :  { %v89_v28 = vpop.f32.mrf.mxu0 }
  0xd1   :  { %v157_v30 = vadd.f32 %v152_v27, %v128_v26  ;;  %v126_v31 = vmul.f32 %v113_v15, %v89_v28  ;;  %v158_v35 = vmax.f32 %v154_v29, 0.0 }
  0xd3   :  { %v161_v33 = vmax.f32 %v157_v30, 0.0  ;;  %v155_v34 = vadd.f32 %v142_v18, %v126_v31 }
  0xd5   :  { %v212_v36 = vpack.c.bf16 %v161_v33, %v160_v32  ;;  %v159_v37 = vmax.f32 %v155_v34, 0.0 }
  0xd7   :  { %214 = vst [vmem:[%s302_s3 + $0x8] sm:$0xff] %v212_v36   ;;  %v207_v38 = vpack.c.bf16 %v159_v37, %v158_v35 }
  0xd9   :  { %208 = vst [vmem:[%s302_s3] sm:$0xff] %v207_v38  }

// kernel: motion_decoder_forward.8
= control target key start
LH: loop header
LB: loop body
LE: loop exit
PB: predicated region body
PF: predicated region fallthrough
CT: control target
= control target key end

     0   :  { %vm42_vm0 = vcmask 261120   ;;  %v122_v12 = vlaneseq  ;;  %vm133_vm1 = vcmask 130112   ;;  %vm140_vm2 = vcmask 195712   ;;  %s234_s0 = inlined_call_operand.vmem [shape: bf16[32,128], index: 0, kind: input, shape index: {}]   ;;  %s235_s1 = inlined_call_operand.vmem [shape: bf16[32,32], index: 1, kind: input, shape index: {}]   ;;  %s236_s2 = inlined_call_operand.vmem [shape: f32[1,2,32], index: 2, kind: output, shape index: {}]  }
   0x1   :  { %v200_v0 = vld [vmem:[%s234_s0 + $0x8] sm:$0xff]   ;;  %v201_v1 = vld [vmem:[%s234_s0] sm:$0xff]   ;;  %vm147_vm3 = vcmask 261312   ;;  %vm174_vm4 = vcmask 1040384   ;;  %vm176_vm5 = vcmask 254976  }
   0x2   :  { %192 = vmatprep.subr.bf16.mxu0 %v200_v0  ;;  %v202_v2 = vld [vmem:[%s235_s1] sm:$0xff]   ;;  %v203_v3 = vld [vmem:[%s235_s1 + $0x8] sm:$0xff]   ;;  %v123_v13 = vand.u32 127, %v122_v12  ;;  %v125_v17 = vshrl.u32 %v122_v12, 7 }
   0x3   :  { %193 = vmatpush3.bf16.msra.mxu0 %v200_v0  ;;  %196 = vmatprep.mubr.msk.bf16.mxu0 %vm42_vm0, %v202_v2 }
   0x4   :  { %194 = vmatprep.subr.bf16.mxu0 %v201_v1  ;;  %v128_v15 = vadd.s32 4294967288, %v123_v13  ;;  %v142_v20 = vadd.s32 4294967272, %v123_v13  ;;  %v135_v21 = vadd.s32 4294967280, %v123_v13  ;;  %v126_v23 = vsub.s32 %v123_v13, %v125_v17 }
   0x6   :  { %v131_v19 = vsub.s32 %v128_v15, %v125_v17  ;;  %v145_v26 = vsub.s32 %v142_v20, %v125_v17  ;;  %v138_v27 = vsub.s32 %v135_v21, %v125_v17 }
   0x7   :  { %195 = vmatpush3.bf16.msra.mxu0 %v201_v1 }
   0xa   :  { %197 = vmatmul.mubr.msk.bf16.vlgmr.msra.gmra.mxu0 %vm42_vm0, %v203_v3 }
  0xca   :  { %v198_v4 = vpop.f32.mrf.mxu0 }
  0xcb   :  { %102 = vadd.xlane.f32.xlu0 %v198_v4  ;;  %v108_v5 = vmul.f32 %v198_v4, %v198_v4 }
  0xcc   :  { %v83_v6 = vpop.f32.mrf.mxu0 }
  0xcd   :  { %114 = vadd.xlane.f32.xlu1 %v108_v5  ;;  %v106_v8 = vmul.f32 %v83_v6, %v83_v6 }
  0xce   :  { %v199_v7 = vpop.f32.mrf.mxu0 }
  0xcf   :  { %98 = vadd.xlane.f32.xlu0 %v83_v6  ;;  %v109_v11 = vmul.f32 %v199_v7, %v199_v7 }
  0xd0   :  { %v86_v9 = vpop.f32.mrf.mxu0 }
  0xd1   :  { %110 = vadd.xlane.f32.xlu1 %v106_v8  ;;  %v107_v10 = vmul.f32 %v86_v9, %v86_v9 }
  0xd3   :  { %100 = vadd.xlane.f32.xlu0 %v86_v9 }
  0xd5   :  { %112 = vadd.xlane.f32.xlu1 %v107_v10 }
  0xd7   :  { %104 = vadd.xlane.f32.xlu0 %v199_v7 }
  0xd9   :  { %116 = vadd.xlane.f32.xlu1 %v109_v11 }
 0x154   :  { %v103_v14 = vpop.xlane.xlu0 %102 }
 0x155   :  { %v139_v36 = vrot.slane %v103_v14, %v138_v27 }
 0x156   :  { %v115_v16 = vpop.xlane.xlu1 %114 }
 0x157   :  { %v166_v37 = vrot.slane %v115_v16, %v138_v27 }
 0x158   :  { %v99_v18 = vpop.xlane.xlu0 %98 }
 0x159   :  { %v127_v29 = vrot.slane %v99_v18, %v126_v23 }
 0x15a   :  { %v111_v22 = vpop.xlane.xlu1 %110 }
 0x15b   :  { %v157_v30 = vrot.slane %v111_v22, %v126_v23 }
 0x15c   :  { %v101_v24 = vpop.xlane.xlu0 %100 }
 0x15d   :  { %v132_v25 = vrot.slane %v101_v24, %v131_v19 }
 0x15e   :  { %v113_v28 = vpop.xlane.xlu1 %112 }
 0x15f   :  { %v161_v31 = vrot.slane %v113_v28, %v131_v19  ;;  %v134_v33 = vsel %vm133_vm1, %v132_v25, %v127_v29 }
 0x160   :  { %v105_v32 = vpop.xlane.xlu0 %104  ;;  %v141_v40 = vsel %vm140_vm2, %v139_v36, %v134_v33 }
 0x161   :  { %v162_v34 = vsel %vm133_vm1, %v161_v31, %v157_v30  ;;  %v146_v35 = vrot.slane %v105_v32, %v145_v26 }
 0x162   :  { %v117_v38 = vpop.xlane.xlu1 %116  ;;  %v167_v41 = vsel %vm140_vm2, %v166_v37, %v162_v34 }
 0x163   :  { %v171_v39 = vrot.slane %v117_v38, %v145_v26  ;;  %v148_v42 = vsel %vm147_vm3, %v146_v35, %v141_v40 }
 0x165   :  { %v172_v43 = vsel %vm147_vm3, %v171_v39, %v167_v41 }
 0x166   :  { %v175_v44 = vsel %vm174_vm4, %v148_v42, %v172_v43 }
 0x167   :  { %177 = vst.msk [vmem:[%s236_s2] sm:$0x3] %vm176_vm5, %v175_v44 }

// kernel: motion_decoder_forward.12
= control target key start
LH: loop header
LB: loop body
LE: loop exit
PB: predicated region body
PF: predicated region fallthrough
CT: control target
= control target key end

     0   :  { %s539_s9 = smov 0   ;;  %s541_s10 = smov 0   ;;  %s599_s0 = inlined_call_operand.vmem [shape: bf16[32,512], index: 0, kind: input, shape index: {}]   ;;  %s600_s1 = inlined_call_operand.vmem [shape: bf16[32,32], index: 1, kind: input, shape index: {}]   ;;  %s601_s2 = inlined_call_operand.vmem [shape: f32[2,2,32], index: 2, kind: output, shape index: {}]  }
   0x1   :  { %s543_s11 = smov 0  }
   0x2 LB: > { %s441_s12 = sadd.s32 4294967295, %s521_s11   ;;  %s556_s13 = sadd.s32 1, %s521_s11   ;;  %s521_s11 = sphi %s543_s11, %s604_s11   ;;  %s517_s10 = sphi %s541_s10, %s603_s10   ;;  %s513_s9 = sphi %s539_s9, %s602_s9  }
   0x3   : > { %s16_s14 = ssub.s32 %s521_s11, %s556_s13  ;;  %s19_s15 = sadd.s32 1, %s517_s10 }
   0x4   : > { %p17_p0 = scmp.eq.s32.totalorder %s16_s14, 0  ;;  %p26_p1 = scmp.ne.s32.totalorder %s517_s10, %s513_s9 }
   0x5   : > { %p27_p2 = scmp.eq.s32.totalorder %s521_s11, 0  ;;  %p444_p4 = scmp.ge.s32.totalorder %s521_s11, 2 }
   0x6   : > { %s565_s16 = scalar_select %p17_p0, %s517_s10, %s19_s15  }
   0x7   : > { %p28_p3 = por %p27_p2, %p26_p1  ;;  %102 = sbr.rel (%p444_p4) target bundleno = 18 (0x12), region = 20 }
   0xc   : > { %105 = sbr.rel (!%p28_p3) target bundleno = 18 (0x12), region = 24  ;;  %s107_s17 = sand.u32 (%p28_p3), 1, %s517_s10  }
   0xd   : > { %s461_s18 = sshll.u32 (%p28_p3), %s521_s11, 3  ;;  %s445_s19 = sshll.u32 (%p28_p3), %s107_s17, 5 }
   0xe   : > { %s112_s22 = scalar_lea.vmem (%p28_p3), %s599_s0, %s461_s18  ;;  %s109_s23 = scalar_lea.vmem (%p28_p3), [#allocation2], %s445_s19 }
   0xf   : > { %v147_v0 = vld [vmem:[%s112_s22] sm:$0xff] (%p28_p3)  ;;  %v149_v1 = vld [vmem:[%s112_s22 + $0x10] sm:$0xff] (%p28_p3) }
  0x10   : > { %v151_v2 = vld [vmem:[%s112_s22 + $0x20] sm:$0xff] (%p28_p3)  ;;  %148 = vst [vmem:[%s109_s23] sm:$0xff] (%p28_p3), %v147_v0  ;;  %150 = vst [vmem:[%s109_s23 + $0x8] sm:$0xff] (%p28_p3), %v149_v1  ;;  %v153_v3 = vld [vmem:[%s112_s22 + $0x30] sm:$0xff] (%p28_p3) }
  0x11   : > { %152 = vst [vmem:[%s109_s23 + $0x10] sm:$0xff] %v151_v2  ;;  %154 = vst [vmem:[%s109_s23 + $0x18] sm:$0xff] %v153_v3 }
  0x12 PF: > { %p448_p5 = scmp.ge.s32.totalorder %s521_s11, 1  ;;  %p159_p6 = scmp.lt.s32.totalorder %s521_s11, 3 }
  0x14   : > { %p160_p7 = pnand %p448_p5, %p159_p6 }
  0x15   : > { %s166_s24 = sand.u32 (!%p160_p7), 1, %s513_s9   ;;  %p187_p8 = scmp.lt.s32.totalorder (!%p160_p7), %s441_s12, 1 }
  0x16   : > { %163 = sbr.rel (%p160_p7) target bundleno = 391 (0x187), region = 62  ;;  %s449_s25 = sshll.u32 (!%p160_p7), %s166_s24, 5 }
  0x17   : > { %s168_s26 = scalar_lea.vmem (!%p160_p7), [#allocation2], %s449_s25 }
  0x1b   : > { %v523_v4 = vmov 0   ;;  %v491_v5 = vld [vmem:[%s168_s26 + $0x14] ss:$8 sps:$4 sm:$0xff]   ;;  %v493_v6 = vld [vmem:[%s168_s26 + $0x10] ss:$8 sps:$4 sm:$0xff]   ;;  %v497_v9 = vld [vmem:[%s600_s1] sm:$0xff]   ;;  %v326_v35 = vlaneseq }
  0x1c   : > { %269 = vmatprep.mubr.bf16.mxu0 %v523_v4  ;;  %279 = vmatprep.mubr.bf16.mxu1 %v523_v4  ;;  %v494_v7 = vld [vmem:[%s168_s26 + $0x4] ss:$8 sps:$4 sm:$0xff]   ;;  %v496_v8 = vld [vmem:[%s168_s26] ss:$8 sps:$4 sm:$0xff]   ;;  %vm230_vm0 = vcmask 261120   ;;  %s606_s12 = smov (!%p187_p8, %s441_s12), 1 }
  0x1d   : > { %249 = vmatprep.subr.bf16.mxu0 %v491_v5  ;;  %462 = vmatprep.subr.bf16.mxu1 %v491_v5  ;;  %v498_v10 = vld [vmem:[%s600_s1 + $0x8] sm:$0xff]   ;;  %v327_v36 = vand.u32 127, %v326_v35  ;;  %v329_v40 = vshrl.u32 %v326_v35, 7  ;;  %vm337_vm1 = vcmask 130112   ;;  %vm344_vm2 = vcmask 195712   ;;  %s450_s3 = sshll.u32 %s606_s12, 1 }
  0x1e   : > { %250 = vmatpush1.bf16.msra.mxu0 %v493_v6  ;;  %464 = vmatpush1.bf16.msra.mxu1 %v493_v6  ;;  %vm351_vm3 = vcmask 261312   ;;  %vm378_vm4 = vcmask 1040384   ;;  %s190_s6 = scalar_lea.vmem %s601_s2, %s450_s3  ;;  %vm380_vm5 = vcmask 254976  }
  0x1f   : > { %251 = vmatprep.subr.bf16.mxu0 %v494_v7  ;;  %463 = vmatprep.subr.bf16.mxu1 %v494_v7  ;;  %v332_v38 = vadd.s32 4294967288, %v327_v36  ;;  %v346_v43 = vadd.s32 4294967272, %v327_v36  ;;  %v339_v44 = vadd.s32 4294967280, %v327_v36  ;;  %v330_v46 = vsub.s32 %v327_v36, %v329_v40 }
  0x21   : > { %v335_v42 = vsub.s32 %v332_v38, %v329_v40  ;;  %v349_v49 = vsub.s32 %v346_v43, %v329_v40  ;;  %v342_v50 = vsub.s32 %v339_v44, %v329_v40 }
  0x22   : > { %252 = vmatpush1.bf16.msra.mxu0 %v496_v8  ;;  %465 = vmatpush1.bf16.msra.mxu1 %v496_v8 }
  0x25   : > { %457 = vmatmul.mubr.msk.bf16.vlgmr.msra.gmra.mxu0 %vm230_vm0, %v497_v9  ;;  %458 = vmatmul.mubr.msk.bf16.vlgmr.msra.gmra.mxu1 %vm230_vm0, %v498_v10 }
  0xe5   : > { %v271_v11 = vpop.f32.mrf.mxu0  ;;  %v281_v12 = vpop.f32.mrf.mxu1 }
  0xe6   : > { %v302_v15 = vmul.f32 %v271_v11, %v271_v11  ;;  %v306_v19 = vmul.f32 %v281_v12, %v281_v12 }
  0xe7   : > { %v273_v13 = vpop.f32.mrf.mxu0  ;;  %v283_v14 = vpop.f32.mrf.mxu1 }
  0xe8   : > { %v303_v16 = vmul.f32 %v273_v13, %v273_v13  ;;  %v290_v17 = vadd.f32 %v273_v13, %v271_v11  ;;  %v307_v20 = vmul.f32 %v283_v14, %v283_v14  ;;  %v296_v24 = vadd.f32 %v283_v14, %v281_v12 }
  0xe9   : > { %v275_v18 = vpop.f32.mrf.mxu0  ;;  %v285_v22 = vpop.f32.mrf.mxu1 }
  0xea   : > { %291 = vadd.xlane.f32.xlu0 %v290_v17  ;;  %v310_v21 = vadd.f32 %v303_v16, %v302_v15  ;;  %v316_v26 = vadd.f32 %v307_v20, %v306_v19  ;;  %v304_v28 = vmul.f32 %v275_v18, %v275_v18  ;;  %v308_v32 = vmul.f32 %v285_v22, %v285_v22 }
  0xeb   : > { %v277_v23 = vpop.f32.mrf.mxu0  ;;  %v287_v27 = vpop.f32.mrf.mxu1 }
  0xec   : > { %311 = vadd.xlane.f32.xlu1 %v310_v21  ;;  %v305_v25 = vmul.f32 %v277_v23, %v277_v23  ;;  %v293_v29 = vadd.f32 %v277_v23, %v275_v18  ;;  %v309_v30 = vmul.f32 %v287_v27, %v287_v27  ;;  %v299_v33 = vadd.f32 %v287_v27, %v285_v22 }
  0xee   : > { %297 = vadd.xlane.f32.xlu0 %v296_v24  ;;  %v313_v31 = vadd.f32 %v305_v25, %v304_v28  ;;  %v319_v34 = vadd.f32 %v309_v30, %v308_v32 }
  0xf0   : > { %317 = vadd.xlane.f32.xlu1 %v316_v26 }
  0xf2   : > { %294 = vadd.xlane.f32.xlu0 %v293_v29 }
  0xf4   : > { %314 = vadd.xlane.f32.xlu1 %v313_v31 }
  0xf6   : > { %300 = vadd.xlane.f32.xlu0 %v299_v33 }
  0xf8   : > { %320 = vadd.xlane.f32.xlu1 %v319_v34 }
 0x173   : > { %v292_v37 = vpop.xlane.xlu0 %291 }
 0x174   : > { %v331_v52 = vrot.slane %v292_v37, %v330_v46 }
 0x175   : > { %v312_v39 = vpop.xlane.xlu1 %311 }
 0x176   : > { %v361_v53 = vrot.slane %v312_v39, %v330_v46 }
 0x177   : > { %v298_v41 = vpop.xlane.xlu0 %297 }
 0x178   : > { %v343_v59 = vrot.slane %v298_v41, %v342_v50 }
 0x179   : > { %v318_v45 = vpop.xlane.xlu1 %317 }
 0x17a   : > { %v370_v60 = vrot.slane %v318_v45, %v342_v50 }
 0x17b   : > { %v295_v47 = vpop.xlane.xlu0 %294 }
 0x17c   : > { %v336_v48 = vrot.slane %v295_v47, %v335_v42 }
 0x17d   : > { %v315_v51 = vpop.xlane.xlu1 %314 }
 0x17e   : > { %v365_v54 = vrot.slane %v315_v51, %v335_v42  ;;  %v338_v56 = vsel %vm337_vm1, %v336_v48, %v331_v52 }
 0x17f   : > { %v301_v55 = vpop.xlane.xlu0 %300  ;;  %v345_v63 = vsel %vm344_vm2, %v343_v59, %v338_v56 }
 0x180   : > { %v366_v57 = vsel %vm337_vm1, %v365_v54, %v361_v53  ;;  %v350_v58 = vrot.slane %v301_v55, %v349_v49 }
 0x181   : > { %v321_v61 = vpop.xlane.xlu1 %320  ;;  %v371_v0 = vsel %vm344_vm2, %v370_v60, %v366_v57 }
 0x182   : > { %v375_v62 = vrot.slane %v321_v61, %v349_v49  ;;  %v352_v1 = vsel %vm351_vm3, %v350_v58, %v345_v63 }
 0x184   : > { %v376_v2 = vsel %vm351_vm3, %v375_v62, %v371_v0 }
 0x185   : > { %v379_v3 = vsel %vm378_vm4, %v352_v1, %v376_v2 }
 0x186   : > { %381 = vst.msk [vmem:[%s190_s6] sm:$0x3] %vm380_vm5, %v379_v3 }
 0x187 PF: > { %p9_p9 = scmp.ge.s32.totalorder %s556_s13, 4   ;;  %s602_s9 = smov %s517_s10 }
 0x188   : > { %s603_s10 = smov %s565_s16  ;;  %s604_s11 = smov %s556_s13 }
 0x189   :  { %11 = sbr.rel (!%p9_p9) target bundleno = 2 (0x2), region = 101 }

// kernel: motion_decoder_forward.13
= control target key start
LH: loop header
LB: loop body
LE: loop exit
PB: predicated region body
PF: predicated region fallthrough
CT: control target
= control target key end

     0   :  { %s647_s12 = smov 0   ;;  %s649_s13 = smov 0   ;;  %s741_s0 = inlined_call_operand.vmem [shape: bf16[32,512], index: 0, kind: input, shape index: {}]   ;;  %s742_s1 = inlined_call_operand.vmem [shape: bf16[32,32], index: 1, kind: input, shape index: {}]   ;;  %s743_s2 = inlined_call_operand.vmem [shape: f32[2,32,1], index: 2, kind: input, shape index: {}]   ;;  %s744_s3 = inlined_call_operand.vmem [shape: bf16[32,512], index: 3, kind: output, shape index: {}]  }
   0x1   :  { %s651_s14 = smov 0  }
   0x2 LB: > { %s526_s15 = sadd.s32 4294967295, %s624_s14   ;;  %s664_s16 = sadd.s32 1, %s624_s14   ;;  %s624_s14 = sphi %s651_s14, %s748_s14   ;;  %s620_s13 = sphi %s649_s13, %s747_s13   ;;  %s616_s12 = sphi %s647_s12, %s746_s12  }
   0x3   : > { %s17_s17 = ssub.s32 %s624_s14, %s664_s16  ;;  %s20_s18 = sadd.s32 1, %s620_s13 }
   0x4   : > { %p18_p0 = scmp.eq.s32.totalorder %s17_s17, 0  ;;  %p27_p1 = scmp.ne.s32.totalorder %s620_s13, %s616_s12 }
   0x5   : > { %p28_p2 = scmp.eq.s32.totalorder %s624_s14, 0  ;;  %p99_p3 = scmp.eq.s32.totalorder %s526_s15, 1 }
   0x6   : > { %s675_s19 = scalar_select %p18_p0, %s620_s13, %s20_s18  }
   0x7   : > { %p29_p4 = por %p28_p2, %p27_p1  ;;  %p677_p5 = por %p99_p3, %p27_p1 }
   0x8   : > { %p529_p6 = scmp.ge.s32.totalorder %s624_s14, 2 }
   0xa   : > { %127 = sbr.rel (%p529_p6) target bundleno = 21 (0x15), region = 24 }
   0xf   : > { %130 = sbr.rel (!%p29_p4) target bundleno = 21 (0x15), region = 28  ;;  %s132_s21 = sand.u32 (%p29_p4), 1, %s620_s13  }
  0x10   : > { %s557_s22 = sshll.u32 (%p29_p4), %s624_s14, 3  ;;  %s530_s23 = sshll.u32 (%p29_p4), %s132_s21, 5 }
  0x11   : > { %s137_s26 = scalar_lea.vmem (%p29_p4), %s741_s0, %s557_s22  ;;  %s134_s27 = scalar_lea.vmem (%p29_p4), [#allocation2], %s530_s23 }
  0x12   : > { %v172_v0 = vld [vmem:[%s137_s26] sm:$0xff] (%p29_p4)  ;;  %v174_v1 = vld [vmem:[%s137_s26 + $0x10] sm:$0xff] (%p29_p4) }
  0x13   : > { %v176_v2 = vld [vmem:[%s137_s26 + $0x20] sm:$0xff] (%p29_p4)  ;;  %173 = vst [vmem:[%s134_s27] sm:$0xff] (%p29_p4), %v172_v0  ;;  %175 = vst [vmem:[%s134_s27 + $0x8] sm:$0xff] (%p29_p4), %v174_v1  ;;  %v178_v3 = vld [vmem:[%s137_s26 + $0x30] sm:$0xff] (%p29_p4) }
  0x14   : > { %177 = vst [vmem:[%s134_s27 + $0x10] sm:$0xff] %v176_v2  ;;  %179 = vst [vmem:[%s134_s27 + $0x18] sm:$0xff] %v178_v3 }
  0x15 PF: > { %p533_p7 = scmp.ge.s32.totalorder %s624_s14, 1  ;;  %p184_p8 = scmp.lt.s32.totalorder %s624_s14, 3 }
  0x17   : > { %p185_p9 = pnand %p533_p7, %p184_p8 }
  0x18   : > { %s191_s28 = sand.u32 (!%p185_p9), 1, %s616_s12  }
  0x19   : > { %188 = sbr.rel (%p185_p9) target bundleno = 258 (0x102), region = 66  ;;  %s690_s29 = sshll.u32 (!%p185_p9), %s191_s28, 5 }
  0x1a   : > { %s193_s7 = scalar_lea.vmem (!%p185_p9), [#allocation2], %s690_s29  ;;  %s212_s4 = scalar_lea.vmem (!%p185_p9), [#allocation3], %s690_s29 }
  0x1e   : > { %v626_v4 = vmov 0   ;;  %v316_v5 = vld [vmem:[%s743_s2 + $0x10] sm:$0xff]  ;;  %v314_v6 = vld [vmem:[%s743_s2] sm:$0xff]  ;;  %v317_v10 = vld [vmem:[%s743_s2 + $0x18] sm:$0xff]  ;;  %vm254_vm0 = vcmask 261120   ;;  %s562_s5 = sshll.u32 (%p677_p5), %s526_s15, 3 }
  0x1f   : > { %293 = vmatprep.mubr.bf16.mxu0 %v626_v4  ;;  %303 = vmatprep.mubr.bf16.mxu1 %v626_v4  ;;  %v594_v7 = vld [vmem:[%s193_s7 + $0x14] ss:$8 sps:$4 sm:$0xff]   ;;  %v596_v8 = vld [vmem:[%s193_s7 + $0x10] ss:$8 sps:$4 sm:$0xff]   ;;  %v597_v9 = vld [vmem:[%s193_s7 + $0x4] ss:$8 sps:$4 sm:$0xff]  }
  0x20   : > { %593 = vset.pattern.permute.xlu1 %v626_v4  ;;  %592 = vset.pattern.permute.xlu0 %v626_v4  ;;  %v599_v11 = vld [vmem:[%s193_s7] ss:$8 sps:$4 sm:$0xff]   ;;  %v547_v17 = vld [vmem:[%s743_s2 + $0x38] sm:$0xff]  ;;  %v546_v18 = vld [vmem:[%s743_s2 + $0x30] sm:$0xff]  ;;  %s424_s7 = scalar_lea.vmem (%p677_p5), %s744_s3, %s562_s5 }
  0x21   : > { %330 = vperm.xlu1 %593, %v316_v5   ;;  %320 = vperm.xlu0 %592, %v314_v6   ;;  %v315_v12 = vld [vmem:[%s743_s2 + $0x8] sm:$0xff]  ;;  %v600_v13 = vld [vmem:[%s742_s1] sm:$0xff]  }
  0x22   : > { %273 = vmatprep.subr.bf16.mxu0 %v594_v7  ;;  %563 = vmatprep.subr.bf16.mxu1 %v594_v7  ;;  %v601_v14 = vld [vmem:[%s742_s1 + $0x8] sm:$0xff]   ;;  %v544_v16 = vld [vmem:[%s743_s2 + $0x20] sm:$0xff] }
  0x23   : > { %274 = vmatpush1.bf16.msra.mxu0 %v596_v8  ;;  %565 = vmatpush1.bf16.msra.mxu1 %v596_v8  ;;  %v545_v15 = vld [vmem:[%s743_s2 + $0x28] sm:$0xff] }
  0x24   : > { %275 = vmatprep.subr.bf16.mxu0 %v597_v9  ;;  %564 = vmatprep.subr.bf16.mxu1 %v597_v9 }
  0x25   : > { %335 = vperm.xlu1 %593, %v317_v10   ;;  %325 = vperm.xlu0 %592, %v315_v12  }
  0x27   : > { %276 = vmatpush1.bf16.msra.mxu0 %v599_v11  ;;  %566 = vmatpush1.bf16.msra.mxu1 %v599_v11 }
  0x29   : > { %358 = vperm.xlu1 %593, %v545_v15   ;;  %353 = vperm.xlu0 %592, %v544_v16  }
  0x2a   : > { %542 = vmatmul.mubr.msk.bf16.vlgmr.msra.gmra.mxu0 %vm254_vm0, %v600_v13  ;;  %543 = vmatmul.mubr.msk.bf16.vlgmr.msra.gmra.mxu1 %vm254_vm0, %v601_v14 }
  0x2d   : > { %368 = vperm.xlu1 %593, %v547_v17   ;;  %363 = vperm.xlu0 %592, %v546_v18  }
  0x9c   : > { %v321_v19 = vpop.permute.xlu0 %320  ;;  %v331_v20 = vpop.permute.xlu1 %330 }
  0xa0   : > { %v326_v21 = vpop.permute.xlu0 %325  ;;  %v336_v22 = vpop.permute.xlu1 %335 }
  0xa4   : > { %v354_v23 = vpop.permute.xlu0 %353  ;;  %v359_v26 = vpop.permute.xlu1 %358 }
  0xa8   : > { %v364_v27 = vpop.permute.xlu0 %363  ;;  %v369_v46 = vpop.permute.xlu1 %368 }
  0xea   : > { %v295_v24 = vpop.f32.mrf.mxu0  ;;  %v305_v25 = vpop.f32.mrf.mxu1 }
  0xeb   : > { %v338_v28 = vmul.f32 %v321_v19, %v295_v24  ;;  %v342_v29 = vmul.f32 %v331_v20, %v305_v25 }
  0xec   : > { %v297_v30 = vpop.f32.mrf.mxu0  ;;  %v307_v31 = vpop.f32.mrf.mxu1 }
  0xed   : > { %v371_v32 = vadd.f32 %v354_v23, %v338_v28  ;;  %v375_v33 = vadd.f32 %v364_v27, %v342_v29  ;;  %v339_v34 = vmul.f32 %v321_v19, %v297_v30  ;;  %v343_v35 = vmul.f32 %v331_v20, %v307_v31 }
  0xee   : > { %v299_v36 = vpop.f32.mrf.mxu0  ;;  %v309_v37 = vpop.f32.mrf.mxu1 }
  0xef   : > { %v372_v38 = vadd.f32 %v354_v23, %v339_v34  ;;  %v376_v39 = vadd.f32 %v364_v27, %v343_v35  ;;  %v379_v40 = vmax.f32 %v371_v32, 0.0  ;;  %v383_v41 = vmax.f32 %v375_v33, 0.0 }
  0xf0   : > { %v340_v42 = vmul.f32 %v326_v21, %v299_v36  ;;  %v344_v43 = vmul.f32 %v336_v22, %v309_v37  ;;  %v301_v44 = vpop.f32.mrf.mxu0  ;;  %v311_v45 = vpop.f32.mrf.mxu1 }
  0xf1   : > { %v380_v47 = vmax.f32 %v372_v38, 0.0  ;;  %v384_v48 = vmax.f32 %v376_v39, 0.0  ;;  %v341_v49 = vmul.f32 %v326_v21, %v301_v44  ;;  %v345_v50 = vmul.f32 %v336_v22, %v311_v45 }
  0xf2   : > { %v373_v51 = vadd.f32 %v359_v26, %v340_v42  ;;  %v377_v52 = vadd.f32 %v369_v46, %v344_v43 }
  0xf3   : > { %v558_v53 = vpack.c.bf16 %v380_v47, %v379_v40  ;;  %v560_v54 = vpack.c.bf16 %v384_v48, %v383_v41  ;;  %v374_v55 = vadd.f32 %v359_v26, %v341_v49  ;;  %v378_v56 = vadd.f32 %v369_v46, %v345_v50 }
  0xf4   : > { %v381_v57 = vmax.f32 %v373_v51, 0.0  ;;  %v385_v58 = vmax.f32 %v377_v52, 0.0 }
  0xf5   : > { %411 = vst [vmem:[%s212_s4] sm:$0xff] %v558_v53  ;;  %413 = vst [vmem:[%s212_s4 + $0x10] sm:$0xff] %v560_v54  ;;  %v382_v59 = vmax.f32 %v374_v55, 0.0  ;;  %v386_v60 = vmax.f32 %v378_v56, 0.0  ;;  %421 = sbr.rel (!%p677_p5) target bundleno = 258 (0x102), region = 74 }
  0xf7   : > { %v559_v61 = vpack.c.bf16 %v382_v59, %v381_v57  ;;  %v561_v62 = vpack.c.bf16 %v386_v60, %v385_v58 }
  0xf9   : > { %412 = vst [vmem:[%s212_s4 + $0x8] sm:$0xff] %v559_v61  ;;  %414 = vst [vmem:[%s212_s4 + $0x18] sm:$0xff] %v561_v62 }
  0xfc   : > { %v459_v63 = vld [vmem:[%s212_s4] sm:$0xff]  ;;  %v463_v1 = vld [vmem:[%s212_s4 + $0x10] sm:$0xff] }
  0xfd   : > { %460 = vst [vmem:[%s424_s7] sm:$0xff] %v459_v63  ;;  %464 = vst [vmem:[%s424_s7 + $0x20] sm:$0xff] %v463_v1 }
 0x100   : > { %v461_v0 = vld [vmem:[%s212_s4 + $0x8] sm:$0xff]  ;;  %v465_v2 = vld [vmem:[%s212_s4 + $0x18] sm:$0xff] }
 0x101   : > { %462 = vst [vmem:[%s424_s7 + $0x10] sm:$0xff] %v461_v0  ;;  %466 = vst [vmem:[%s424_s7 + $0x30] sm:$0xff] %v465_v2 }
 0x102 PF: > { %p10_p10 = scmp.ge.s32.totalorder %s664_s16, 4   ;;  %s746_s12 = smov %s620_s13 }
 0x103   : > { %s747_s13 = smov %s675_s19  ;;  %s748_s14 = smov %s664_s16 }
 0x104   :  { %12 = sbr.rel (!%p10_p10) target bundleno = 2 (0x2), region = 144 }

// kernel: motion_decoder_forward.14
= control target key start
LH: loop header
LB: loop body
LE: loop exit
PB: predicated region body
PF: predicated region fallthrough
CT: control target
= control target key end

     0   :  { %s852_s9 = smov 0   ;;  %s854_s10 = smov 0   ;;  %s964_s0 = inlined_call_operand.vmem [shape: bf16[32,2048], index: 0, kind: input, shape index: {}]   ;;  %s965_s1 = inlined_call_operand.vmem [shape: bf16[32,32], index: 1, kind: input, shape index: {}]   ;;  %s966_s2 = inlined_call_operand.vmem [shape: f32[2,2,32], index: 2, kind: output, shape index: {}]  }
   0x1   :  { %s856_s11 = smov 0  }
   0x2 LB: > { %s746_s12 = sadd.s32 4294967295, %s834_s11   ;;  %s869_s13 = sadd.s32 1, %s834_s11   ;;  %s834_s11 = sphi %s856_s11, %s969_s11   ;;  %s830_s10 = sphi %s854_s10, %s968_s10   ;;  %s826_s9 = sphi %s852_s9, %s967_s9  }
   0x3   : > { %s16_s14 = ssub.s32 %s834_s11, %s869_s13  ;;  %s19_s15 = sadd.s32 1, %s830_s10 }
   0x4   : > { %p17_p0 = scmp.eq.s32.totalorder %s16_s14, 0  ;;  %p26_p1 = scmp.ne.s32.totalorder %s830_s10, %s826_s9 }
   0x5   : > { %p27_p2 = scmp.eq.s32.totalorder %s834_s11, 0  ;;  %p749_p4 = scmp.ge.s32.totalorder %s834_s11, 2 }
   0x6   : > { %s878_s16 = scalar_select %p17_p0, %s830_s10, %s19_s15  }
   0x7   : > { %p28_p3 = por %p27_p2, %p26_p1  ;;  %102 = sbr.rel (%p749_p4) target bundleno = 24 (0x18), region = 20 }
   0xc   : > { %105 = sbr.rel (!%p28_p3) target bundleno = 24 (0x18), region = 24  ;;  %s107_s17 = sand.u32 (%p28_p3), 1, %s830_s10  }
   0xd   : > { %s784_s18 = sshll.u32 (%p28_p3), %s834_s11, 5  ;;  %s750_s19 = sshll.u32 (%p28_p3), %s107_s17, 7 }
   0xe   : > { %s886_s22 = scalar_lea.vmem (%p28_p3), %s964_s0, %s784_s18  ;;  %s109_s23 = scalar_lea.vmem (%p28_p3), [#allocation2], %s750_s19 }
   0xf   : > { %v125_v0 = vld [vmem:[%s886_s22] sm:$0xff] (%p28_p3)  ;;  %v127_v1 = vld [vmem:[%s886_s22 + $0x8] sm:$0xff] (%p28_p3)  ;;  %v129_v2 = vld [vmem:[%s886_s22 + $0x10] sm:$0xff] (%p28_p3) }
  0x10   : > { %126 = vst [vmem:[%s109_s23] sm:$0xff] (%p28_p3), %v125_v0  ;;  %128 = vst [vmem:[%s109_s23 + $0x8] sm:$0xff] (%p28_p3), %v127_v1  ;;  %v131_v3 = vld [vmem:[%s886_s22 + $0x18] sm:$0xff] (%p28_p3)  ;;  %v133_v4 = vld [vmem:[%s886_s22 + $0x40] sm:$0xff] (%p28_p3) }
  0x11   : > { %130 = vst [vmem:[%s109_s23 + $0x10] sm:$0xff] %v129_v2  ;;  %v135_v5 = vld [vmem:[%s886_s22 + $0x48] sm:$0xff]  ;;  %132 = vst [vmem:[%s109_s23 + $0x18] sm:$0xff] %v131_v3  ;;  %v137_v6 = vld [vmem:[%s886_s22 + $0x50] sm:$0xff] }
  0x12   : > { %134 = vst [vmem:[%s109_s23 + $0x20] sm:$0xff] %v133_v4  ;;  %136 = vst [vmem:[%s109_s23 + $0x28] sm:$0xff] %v135_v5  ;;  %v139_v7 = vld [vmem:[%s886_s22 + $0x58] sm:$0xff]  ;;  %v141_v8 = vld [vmem:[%s886_s22 + $0x80] sm:$0xff] }
  0x13   : > { %138 = vst [vmem:[%s109_s23 + $0x30] sm:$0xff] %v137_v6  ;;  %140 = vst [vmem:[%s109_s23 + $0x38] sm:$0xff] %v139_v7  ;;  %v143_v9 = vld [vmem:[%s886_s22 + $0x88] sm:$0xff]  ;;  %v145_v10 = vld [vmem:[%s886_s22 + $0x90] sm:$0xff] }
  0x14   : > { %142 = vst [vmem:[%s109_s23 + $0x40] sm:$0xff] %v141_v8  ;;  %v147_v11 = vld [vmem:[%s886_s22 + $0x98] sm:$0xff]  ;;  %144 = vst [vmem:[%s109_s23 + $0x48] sm:$0xff] %v143_v9  ;;  %v149_v12 = vld [vmem:[%s886_s22 + $0xc0] sm:$0xff] }
  0x15   : > { %146 = vst [vmem:[%s109_s23 + $0x50] sm:$0xff] %v145_v10  ;;  %148 = vst [vmem:[%s109_s23 + $0x58] sm:$0xff] %v147_v11  ;;  %v151_v13 = vld [vmem:[%s886_s22 + $0xc8] sm:$0xff]  ;;  %v153_v14 = vld [vmem:[%s886_s22 + $0xd0] sm:$0xff] }
  0x16   : > { %150 = vst [vmem:[%s109_s23 + $0x60] sm:$0xff] %v149_v12  ;;  %152 = vst [vmem:[%s109_s23 + $0x68] sm:$0xff] %v151_v13  ;;  %v155_v15 = vld [vmem:[%s886_s22 + $0xd8] sm:$0xff] }
  0x17   : > { %154 = vst [vmem:[%s109_s23 + $0x70] sm:$0xff] %v153_v14  ;;  %156 = vst [vmem:[%s109_s23 + $0x78] sm:$0xff] %v155_v15 }
  0x18 PF: > { %p753_p5 = scmp.ge.s32.totalorder %s834_s11, 1  ;;  %p161_p6 = scmp.lt.s32.totalorder %s834_s11, 3 }
  0x1a   : > { %p162_p7 = pnand %p753_p5, %p161_p6 }
  0x1b   : > { %s168_s24 = sand.u32 (!%p162_p7), 1, %s826_s9   ;;  %p189_p8 = scmp.lt.s32.totalorder (!%p162_p7), %s746_s12, 1 }
  0x1c   : > { %165 = sbr.rel (%p162_p7) target bundleno = 420 (0x1a4), region = 47  ;;  %s754_s25 = sshll.u32 (!%p162_p7), %s168_s24, 7 }
  0x1d   : > { %s909_s26 = scalar_lea.vmem (!%p162_p7), [#allocation2], %s754_s25 }
  0x21   : > { %v836_v16 = vmov 0   ;;  %v206_v17 = vld [vmem:[%s909_s26 + $0x40] sm:$0xff]  ;;  %v207_v19 = vld [vmem:[%s909_s26 + $0x48] sm:$0xff]  ;;  %v208_v30 = vld [vmem:[%s909_s26 + $0x50] sm:$0xff]  ;;  %vm304_vm0 = vcmask 261120   ;;  %s971_s12 = smov (!%p189_p8, %s746_s12), 1 }
  0x22   : > { %343 = vmatprep.mubr.bf16.mxu0 %v836_v16  ;;  %396 = vmatprep.mubr.bf16.mxu1 %v836_v16  ;;  %v210_v18 = vld [vmem:[%s909_s26 + $0x60] sm:$0xff]  ;;  %v211_v21 = vld [vmem:[%s909_s26 + $0x68] sm:$0xff]  ;;  %v212_v32 = vld [vmem:[%s909_s26 + $0x70] sm:$0xff]  ;;  %vm642_vm1 = vcmask 130112   ;;  %vm649_vm2 = vcmask 195712   ;;  %s755_s3 = sshll.u32 %s971_s12, 1 }
  0x23   : > { %v767_v20 = vcombine.high %v206_v17, %v210_v18  ;;  %v766_v22 = vcombine.low %v206_v17, %v210_v18  ;;  %v198_v23 = vld [vmem:[%s909_s26] sm:$0xff]  ;;  %v769_v25 = vcombine.high %v207_v19, %v211_v21  ;;  %v768_v26 = vcombine.low %v207_v19, %v211_v21  ;;  %v199_v28 = vld [vmem:[%s909_s26 + $0x8] sm:$0xff]  ;;  %v209_v33 = vld [vmem:[%s909_s26 + $0x58] sm:$0xff]  ;;  %s192_s6 = scalar_lea.vmem %s966_s2, %s755_s3 }
  0x24   : > { %v202_v24 = vld [vmem:[%s909_s26 + $0x20] sm:$0xff]  ;;  %v203_v29 = vld [vmem:[%s909_s26 + $0x28] sm:$0xff]  ;;  %v213_v34 = vld [vmem:[%s909_s26 + $0x78] sm:$0xff]  ;;  %v771_v37 = vcombine.high %v208_v30, %v212_v32  ;;  %v770_v42 = vcombine.low %v208_v30, %v212_v32  ;;  %vm656_vm3 = vcmask 261312   ;;  %vm683_vm4 = vcmask 1040384  }
  0x25   : > { %v759_v27 = vcombine.high %v198_v23, %v202_v24  ;;  %323 = vmatprep.subr.bf16.mxu0 %v767_v20  ;;  %v761_v31 = vcombine.high %v199_v28, %v203_v29  ;;  %376 = vmatprep.subr.bf16.mxu1 %v769_v25  ;;  %v758_v35 = vcombine.low %v198_v23, %v202_v24  ;;  %v810_v39 = vld [vmem:[%s965_s1] sm:$0xff]   ;;  %v200_v40 = vld [vmem:[%s909_s26 + $0x10] sm:$0xff]  ;;  %v201_v43 = vld [vmem:[%s909_s26 + $0x18] sm:$0xff]  ;;  %vm685_vm5 = vcmask 254976  }
  0x26   : > { %324 = vmatpush1.bf16.msra.mxu0 %v766_v22  ;;  %377 = vmatpush1.bf16.msra.mxu1 %v768_v26  ;;  %v760_v36 = vcombine.low %v199_v28, %v203_v29  ;;  %v773_v38 = vcombine.high %v209_v33, %v213_v34  ;;  %v204_v41 = vld [vmem:[%s909_s26 + $0x30] sm:$0xff]  ;;  %v205_v44 = vld [vmem:[%s909_s26 + $0x38] sm:$0xff]  ;;  %v772_v45 = vcombine.low %v209_v33, %v213_v34  ;;  %v811_v50 = vld [vmem:[%s965_s1 + $0x8] sm:$0xff]  }
  0x27   : > { %325 = vmatprep.subr.bf16.mxu0 %v759_v27  ;;  %378 = vmatprep.subr.bf16.mxu1 %v761_v31  ;;  %v763_v46 = vcombine.high %v200_v40, %v204_v41  ;;  %v765_v47 = vcombine.high %v201_v43, %v205_v44  ;;  %v762_v48 = vcombine.low %v200_v40, %v204_v41 }
  0x28   : > { %v764_v49 = vcombine.low %v201_v43, %v205_v44 }
  0x2a   : > { %326 = vmatpush1.bf16.msra.mxu0 %v758_v35  ;;  %379 = vmatpush1.bf16.msra.mxu1 %v760_v36 }
  0x2b   : > { %429 = vmatprep.subr.bf16.mxu0 %v771_v37  ;;  %482 = vmatprep.subr.bf16.mxu1 %v773_v38 }
  0x2d   : > { %774 = vmatmul.mubr.msk.bf16.vlgmr.msra.gmra.mxu0 %vm304_vm0, %v810_v39  ;;  %776 = vmatmul.mubr.msk.bf16.vlgmr.msra.gmra.mxu1 %vm304_vm0, %v810_v39 }
  0x2e   : > { %430 = vmatpush1.bf16.msra.mxu0 %v770_v42  ;;  %483 = vmatpush1.bf16.msra.mxu1 %v772_v45 }
  0x2f   : > { %353 = vmatprep.mubr.bf16.mxu0 %v836_v16  ;;  %406 = vmatprep.mubr.bf16.mxu1 %v836_v16 }
  0x30   : > { %431 = vmatprep.subr.bf16.mxu0 %v763_v46  ;;  %484 = vmatprep.subr.bf16.mxu1 %v765_v47 }
  0x32   : > { %432 = vmatpush1.bf16.msra.mxu0 %v762_v48  ;;  %485 = vmatpush1.bf16.msra.mxu1 %v764_v49 }
  0x35   : > { %775 = vmatmul.mubr.msk.bf16.gmra.mxu0 %vm304_vm0, %v811_v50  ;;  %777 = vmatmul.mubr.msk.bf16.gmra.mxu1 %vm304_vm0, %v811_v50 }
  0x36   : > { %449 = vmatprep.mubr.bf16.mxu0 %v836_v16  ;;  %502 = vmatprep.mubr.bf16.mxu1 %v836_v16 }
  0x3d   : > { %778 = vmatmul.mubr.msk.bf16.vlgmr.msra.gmra.mxu0 %vm304_vm0, %v810_v39  ;;  %780 = vmatmul.mubr.msk.bf16.vlgmr.msra.gmra.mxu1 %vm304_vm0, %v810_v39 }
  0x3e   : > { %459 = vmatprep.mubr.bf16.mxu0 %v836_v16  ;;  %512 = vmatprep.mubr.bf16.mxu1 %v836_v16 }
  0x45   : > { %779 = vmatmul.mubr.msk.bf16.gmra.mxu0 %vm304_vm0, %v811_v50  ;;  %781 = vmatmul.mubr.msk.bf16.gmra.mxu1 %vm304_vm0, %v811_v50 }
  0xed   : > { %v345_v51 = vpop.f32.mrf.mxu0  ;;  %v398_v52 = vpop.f32.mrf.mxu1 }
  0xee   : > { %v559_v59 = vmul.f32 %v345_v51, %v345_v51  ;;  %v561_v63 = vmul.f32 %v398_v52, %v398_v52 }
  0xef   : > { %v347_v53 = vpop.f32.mrf.mxu0  ;;  %v400_v54 = vpop.f32.mrf.mxu1 }
  0xf0   : > { %v560_v56 = vmul.f32 %v347_v53, %v347_v53  ;;  %v523_v60 = vadd.f32 %v347_v53, %v345_v51  ;;  %v562_v17 = vmul.f32 %v400_v54, %v400_v54 }
  0xf1   : > { %v349_v55 = vpop.f32.mrf.mxu0  ;;  %v402_v57 = vpop.f32.mrf.mxu1 }
  0xf2   : > { %v591_v0 = vadd.f32 %v560_v56, %v559_v59  ;;  %v524_v4 = vadd.f32 %v523_v60, %v398_v52  ;;  %v567_v5 = vmul.f32 %v349_v55, %v349_v55  ;;  %v569_v18 = vmul.f32 %v402_v57, %v402_v57 }
  0xf3   : > { %v351_v58 = vpop.f32.mrf.mxu0  ;;  %v404_v61 = vpop.f32.mrf.mxu1 }
  0xf4   : > { %v568_v1 = vmul.f32 %v351_v58, %v351_v58  ;;  %v532_v6 = vadd.f32 %v351_v58, %v349_v55  ;;  %v592_v10 = vadd.f32 %v591_v0, %v561_v63  ;;  %v525_v16 = vadd.f32 %v524_v4, %v400_v54 }
  0xf5   : > { %v355_v62 = vpop.f32.mrf.mxu0  ;;  %v408_v2 = vpop.f32.mrf.mxu1  ;;  %v570_v26 = vmul.f32 %v404_v61, %v404_v61 }
  0xf6   : > { %v600_v11 = vadd.f32 %v568_v1, %v567_v5  ;;  %v575_v13 = vmul.f32 %v355_v62, %v355_v62  ;;  %v533_v19 = vadd.f32 %v532_v6, %v402_v57  ;;  %v577_v21 = vmul.f32 %v408_v2, %v408_v2 }
  0xf7   : > { %v357_v3 = vpop.f32.mrf.mxu0  ;;  %v410_v7 = vpop.f32.mrf.mxu1  ;;  %v593_v25 = vadd.f32 %v592_v10, %v562_v17 }
  0xf8   : > { %v576_v8 = vmul.f32 %v357_v3, %v357_v3  ;;  %v541_v14 = vadd.f32 %v357_v3, %v355_v62  ;;  %v601_v27 = vadd.f32 %v600_v11, %v569_v18  ;;  %v534_v35 = vadd.f32 %v533_v19, %v404_v61 }
  0xf9   : > { %v359_v9 = vpop.f32.mrf.mxu0  ;;  %v412_v12 = vpop.f32.mrf.mxu1  ;;  %v578_v36 = vmul.f32 %v410_v7, %v410_v7 }
  0xfa   : > { %v609_v22 = vadd.f32 %v576_v8, %v575_v13  ;;  %v542_v30 = vadd.f32 %v541_v14, %v408_v2  ;;  %v583_v31 = vmul.f32 %v359_v9, %v359_v9  ;;  %v602_v45 = vadd.f32 %v601_v27, %v570_v26 }
  0xfb   : > { %v361_v15 = vpop.f32.mrf.mxu0  ;;  %v414_v20 = vpop.f32.mrf.mxu1  ;;  %v585_v51 = vmul.f32 %v412_v12, %v412_v12 }
  0xfc   : > { %v584_v23 = vmul.f32 %v361_v15, %v361_v15  ;;  %v550_v32 = vadd.f32 %v361_v15, %v359_v9  ;;  %v610_v40 = vadd.f32 %v609_v22, %v577_v21  ;;  %v543_v50 = vadd.f32 %v542_v30, %v410_v7 }
  0xfd   : > { %v451_v24 = vpop.f32.mrf.mxu0  ;;  %v504_v29 = vpop.f32.mrf.mxu1  ;;  %v586_v7 = vmul.f32 %v414_v20, %v414_v20 }
  0xfe   : > { %v526_v28 = vadd.f32 %v525_v16, %v451_v24  ;;  %v563_v33 = vmul.f32 %v451_v24, %v451_v24  ;;  %v618_v41 = vadd.f32 %v584_v23, %v583_v31  ;;  %v565_v43 = vmul.f32 %v504_v29, %v504_v29 }
  0xff   : > { %v453_v34 = vpop.f32.mrf.mxu0  ;;  %v506_v39 = vpop.f32.mrf.mxu1  ;;  %v551_v52 = vadd.f32 %v550_v32, %v412_v12  ;;  %v611_v60 = vadd.f32 %v610_v40, %v578_v36 }
 0x100   : > { %v527_v37 = vadd.f32 %v526_v28, %v453_v34  ;;  %v564_v38 = vmul.f32 %v453_v34, %v453_v34  ;;  %v594_v42 = vadd.f32 %v593_v25, %v563_v33  ;;  %v619_v61 = vadd.f32 %v618_v41, %v585_v51 }
 0x101   : > { %v455_v44 = vpop.f32.mrf.mxu0  ;;  %v508_v48 = vpop.f32.mrf.mxu1  ;;  %v566_v62 = vmul.f32 %v506_v39, %v506_v39  ;;  %v552_v6 = vadd.f32 %v551_v52, %v414_v20 }
 0x102   : > { %v535_v46 = vadd.f32 %v534_v35, %v455_v44  ;;  %v571_v47 = vmul.f32 %v455_v44, %v455_v44  ;;  %v528_v49 = vadd.f32 %v527_v37, %v504_v29  ;;  %v595_v53 = vadd.f32 %v594_v42, %v564_v38 }
 0x103   : > { %v457_v54 = vpop.f32.mrf.mxu0  ;;  %v510_v58 = vpop.f32.mrf.mxu1  ;;  %v573_v8 = vmul.f32 %v508_v48, %v508_v48  ;;  %v620_v16 = vadd.f32 %v619_v61, %v586_v7 }
 0x104   : > { %v603_v55 = vadd.f32 %v602_v45, %v571_v47  ;;  %v536_v56 = vadd.f32 %v535_v46, %v457_v54  ;;  %v572_v57 = vmul.f32 %v457_v54, %v457_v54  ;;  %v529_v59 = vadd.f32 %v528_v49, %v506_v39 }
 0x105   : > { %v461_v63 = vpop.f32.mrf.mxu0  ;;  %v596_v0 = vadd.f32 %v595_v53, %v565_v43  ;;  %v514_v4 = vpop.f32.mrf.mxu1  ;;  %v574_v17 = vmul.f32 %v510_v58, %v510_v58  ;;  %v631_v43 = vlaneseq }
 0x106   : > { %v604_v1 = vadd.f32 %v603_v55, %v572_v57  ;;  %v544_v2 = vadd.f32 %v543_v50, %v461_v63  ;;  %v579_v3 = vmul.f32 %v461_v63, %v461_v63  ;;  %530 = vadd.xlane.f32.xlu0 %v529_v59  ;;  %v537_v5 = vadd.f32 %v536_v56, %v508_v48 }
 0x107   : > { %v463_v9 = vpop.f32.mrf.mxu0  ;;  %v597_v10 = vadd.f32 %v596_v0, %v566_v62  ;;  %v516_v14 = vpop.f32.mrf.mxu1  ;;  %v581_v18 = vmul.f32 %v514_v4, %v514_v4  ;;  %v632_v45 = vand.u32 127, %v631_v43  ;;  %v634_v50 = vshrl.u32 %v631_v43, 7 }
 0x108   : > { %v612_v11 = vadd.f32 %v611_v60, %v579_v3  ;;  %v545_v12 = vadd.f32 %v544_v2, %v463_v9  ;;  %v580_v13 = vmul.f32 %v463_v9, %v463_v9  ;;  %v538_v15 = vadd.f32 %v537_v5, %v510_v58 }
 0x109   : > { %598 = vadd.xlane.f32.xlu1 %v597_v10  ;;  %v465_v19 = vpop.f32.mrf.mxu0  ;;  %v605_v21 = vadd.f32 %v604_v1, %v573_v8  ;;  %v518_v25 = vpop.f32.mrf.mxu1  ;;  %v582_v32 = vmul.f32 %v516_v14, %v516_v14  ;;  %v637_v47 = vadd.s32 4294967288, %v632_v45  ;;  %v644_v49 = vadd.s32 4294967280, %v632_v45 }
 0x10a   : > { %v613_v22 = vadd.f32 %v612_v11, %v580_v13  ;;  %v553_v23 = vadd.f32 %v552_v6, %v465_v19  ;;  %v587_v24 = vmul.f32 %v465_v19, %v465_v19  ;;  %539 = vadd.xlane.f32.xlu0 %v538_v15  ;;  %v546_v20 = vadd.f32 %v545_v12, %v514_v4 }
 0x10b   : > { %v467_v26 = vpop.f32.mrf.mxu0  ;;  %v606_v27 = vadd.f32 %v605_v21, %v574_v17  ;;  %v520_v33 = vpop.f32.mrf.mxu1  ;;  %v589_v35 = vmul.f32 %v518_v25, %v518_v25  ;;  %v651_v51 = vadd.s32 4294967272, %v632_v45  ;;  %v640_v53 = vsub.s32 %v637_v47, %v634_v50 }
 0x10c   : > { %v621_v28 = vadd.f32 %v620_v16, %v587_v24  ;;  %v554_v29 = vadd.f32 %v553_v23, %v467_v26  ;;  %v588_v30 = vmul.f32 %v467_v26, %v467_v26  ;;  %v547_v31 = vadd.f32 %v546_v20, %v516_v14 }
 0x10d   : > { %607 = vadd.xlane.f32.xlu1 %v606_v27  ;;  %v614_v34 = vadd.f32 %v613_v22, %v581_v18  ;;  %v590_v40 = vmul.f32 %v520_v33, %v520_v33  ;;  %v647_v55 = vsub.s32 %v644_v49, %v634_v50  ;;  %v635_v56 = vsub.s32 %v632_v45, %v634_v50 }
 0x10e   : > { %v622_v36 = vadd.f32 %v621_v28, %v588_v30  ;;  %v555_v37 = vadd.f32 %v554_v29, %v518_v25  ;;  %548 = vadd.xlane.f32.xlu0 %v547_v31  ;;  %v654_v57 = vsub.s32 %v651_v51, %v634_v50 }
 0x10f   : > { %v615_v38 = vadd.f32 %v614_v34, %v582_v32 }
 0x110   : > { %v556_v39 = vadd.f32 %v555_v37, %v520_v33  ;;  %v623_v41 = vadd.f32 %v622_v36, %v589_v35 }
 0x111   : > { %616 = vadd.xlane.f32.xlu1 %v615_v38 }
 0x112   : > { %557 = vadd.xlane.f32.xlu0 %v556_v39  ;;  %v624_v42 = vadd.f32 %v623_v41, %v590_v40 }
 0x115   : > { %625 = vadd.xlane.f32.xlu1 %v624_v42 }
 0x18f   : > { %v531_v44 = vpop.xlane.xlu0 %530 }
 0x190   : > { %v636_v0 = vrot.slane %v531_v44, %v635_v56 }
 0x192   : > { %v599_v46 = vpop.xlane.xlu1 %598 }
 0x193   : > { %v540_v48 = vpop.xlane.xlu0 %539  ;;  %v666_v1 = vrot.slane %v599_v46, %v635_v56 }
 0x194   : > { %v641_v59 = vrot.slane %v540_v48, %v640_v53 }
 0x196   : > { %v608_v52 = vpop.xlane.xlu1 %607  ;;  %v643_v4 = vsel %vm642_vm1, %v641_v59, %v636_v0 }
 0x197   : > { %v549_v54 = vpop.xlane.xlu0 %548  ;;  %v670_v60 = vrot.slane %v608_v52, %v640_v53 }
 0x198   : > { %v648_v62 = vrot.slane %v549_v54, %v647_v55 }
 0x199   : > { %v671_v5 = vsel %vm642_vm1, %v670_v60, %v666_v1 }
 0x19a   : > { %v617_v58 = vpop.xlane.xlu1 %616  ;;  %v650_v7 = vsel %vm649_vm2, %v648_v62, %v643_v4 }
 0x19b   : > { %v558_v61 = vpop.xlane.xlu0 %557  ;;  %v675_v63 = vrot.slane %v617_v58, %v647_v55 }
 0x19c   : > { %v655_v2 = vrot.slane %v558_v61, %v654_v57 }
 0x19d   : > { %v676_v8 = vsel %vm649_vm2, %v675_v63, %v671_v5 }
 0x19e   : > { %v626_v3 = vpop.xlane.xlu1 %625  ;;  %v657_v9 = vsel %vm656_vm3, %v655_v2, %v650_v7 }
 0x19f   : > { %v680_v6 = vrot.slane %v626_v3, %v654_v57 }
 0x1a1   : > { %v681_v10 = vsel %vm656_vm3, %v680_v6, %v676_v8 }
 0x1a2   : > { %v684_v11 = vsel %vm683_vm4, %v657_v9, %v681_v10 }
 0x1a3   : > { %686 = vst.msk [vmem:[%s192_s6] sm:$0x3] %vm685_vm5, %v684_v11 }
 0x1a4 PF: > { %p9_p9 = scmp.ge.s32.totalorder %s869_s13, 4   ;;  %s967_s9 = smov %s830_s10 }
 0x1a5   : > { %s968_s10 = smov %s878_s16  ;;  %s969_s11 = smov %s869_s13 }
 0x1a6   :  { %11 = sbr.rel (!%p9_p9) target bundleno = 2 (0x2), region = 86 }

// kernel: motion_decoder_forward.15
= control target key start
LH: loop header
LB: loop body
LE: loop exit
PB: predicated region body
PF: predicated region fallthrough
CT: control target
= control target key end

     0   :  { %s1070_s12 = smov 0   ;;  %s1072_s13 = smov 0   ;;  %s1332_s0 = inlined_call_operand.vmem [shape: bf16[32,2048], index: 0, kind: input, shape index: {}]   ;;  %s1333_s1 = inlined_call_operand.vmem [shape: bf16[32,32], index: 1, kind: input, shape index: {}]   ;;  %s1334_s2 = inlined_call_operand.vmem [shape: f32[2,32,1], index: 2, kind: input, shape index: {}]   ;;  %s1335_s3 = inlined_call_operand.vmem [shape: bf16[32,2048], index: 3, kind: output, shape index: {}]  }
   0x1   :  { %s1074_s14 = smov 0  }
   0x2 LB: > { %s917_s15 = sadd.s32 4294967295, %s1047_s14   ;;  %s1087_s16 = sadd.s32 1, %s1047_s14   ;;  %s1047_s14 = sphi %s1074_s14, %s1339_s14   ;;  %s1043_s13 = sphi %s1072_s13, %s1338_s13   ;;  %s1039_s12 = sphi %s1070_s12, %s1337_s12  }
   0x3   : > { %s17_s17 = ssub.s32 %s1047_s14, %s1087_s16  ;;  %s20_s18 = sadd.s32 1, %s1043_s13 }
   0x4   : > { %p18_p0 = scmp.eq.s32.totalorder %s17_s17, 0  ;;  %p27_p1 = scmp.ne.s32.totalorder %s1043_s13, %s1039_s12 }
   0x5   : > { %p28_p2 = scmp.eq.s32.totalorder %s1047_s14, 0  ;;  %p99_p3 = scmp.eq.s32.totalorder %s917_s15, 1 }
   0x6   : > { %s1098_s19 = scalar_select %p18_p0, %s1043_s13, %s20_s18  }
   0x7   : > { %p29_p4 = por %p28_p2, %p27_p1  ;;  %p1100_p5 = por %p99_p3, %p27_p1 }
   0x8   : > { %p920_p6 = scmp.ge.s32.totalorder %s1047_s14, 2 }
   0xa   : > { %127 = sbr.rel (%p920_p6) target bundleno = 27 (0x1b), region = 24 }
   0xf   : > { %130 = sbr.rel (!%p29_p4) target bundleno = 27 (0x1b), region = 28  ;;  %s132_s21 = sand.u32 (%p29_p4), 1, %s1043_s13  }
  0x10   : > { %s978_s22 = sshll.u32 (%p29_p4), %s1047_s14, 5  ;;  %s921_s23 = sshll.u32 (%p29_p4), %s132_s21, 7 }
  0x11   : > { %s1110_s26 = scalar_lea.vmem (%p29_p4), %s1332_s0, %s978_s22  ;;  %s134_s27 = scalar_lea.vmem (%p29_p4), [#allocation2], %s921_s23 }
  0x12   : > { %v150_v0 = vld [vmem:[%s1110_s26] sm:$0xff] (%p29_p4)  ;;  %v152_v1 = vld [vmem:[%s1110_s26 + $0x8] sm:$0xff] (%p29_p4)  ;;  %v154_v2 = vld [vmem:[%s1110_s26 + $0x10] sm:$0xff] (%p29_p4) }
  0x13   : > { %151 = vst [vmem:[%s134_s27] sm:$0xff] (%p29_p4), %v150_v0  ;;  %153 = vst [vmem:[%s134_s27 + $0x8] sm:$0xff] (%p29_p4), %v152_v1  ;;  %v156_v3 = vld [vmem:[%s1110_s26 + $0x18] sm:$0xff] (%p29_p4)  ;;  %v158_v4 = vld [vmem:[%s1110_s26 + $0x40] sm:$0xff] (%p29_p4) }
  0x14   : > { %155 = vst [vmem:[%s134_s27 + $0x10] sm:$0xff] %v154_v2  ;;  %v160_v5 = vld [vmem:[%s1110_s26 + $0x48] sm:$0xff]  ;;  %157 = vst [vmem:[%s134_s27 + $0x18] sm:$0xff] %v156_v3  ;;  %v162_v6 = vld [vmem:[%s1110_s26 + $0x50] sm:$0xff] }
  0x15   : > { %159 = vst [vmem:[%s134_s27 + $0x20] sm:$0xff] %v158_v4  ;;  %161 = vst [vmem:[%s134_s27 + $0x28] sm:$0xff] %v160_v5  ;;  %v164_v7 = vld [vmem:[%s1110_s26 + $0x58] sm:$0xff]  ;;  %v166_v8 = vld [vmem:[%s1110_s26 + $0x80] sm:$0xff] }
  0x16   : > { %163 = vst [vmem:[%s134_s27 + $0x30] sm:$0xff] %v162_v6  ;;  %165 = vst [vmem:[%s134_s27 + $0x38] sm:$0xff] %v164_v7  ;;  %v168_v9 = vld [vmem:[%s1110_s26 + $0x88] sm:$0xff]  ;;  %v170_v10 = vld [vmem:[%s1110_s26 + $0x90] sm:$0xff] }
  0x17   : > { %167 = vst [vmem:[%s134_s27 + $0x40] sm:$0xff] %v166_v8  ;;  %v172_v11 = vld [vmem:[%s1110_s26 + $0x98] sm:$0xff]  ;;  %169 = vst [vmem:[%s134_s27 + $0x48] sm:$0xff] %v168_v9  ;;  %v174_v12 = vld [vmem:[%s1110_s26 + $0xc0] sm:$0xff] }
  0x18   : > { %171 = vst [vmem:[%s134_s27 + $0x50] sm:$0xff] %v170_v10  ;;  %173 = vst [vmem:[%s134_s27 + $0x58] sm:$0xff] %v172_v11  ;;  %v176_v13 = vld [vmem:[%s1110_s26 + $0xc8] sm:$0xff]  ;;  %v178_v14 = vld [vmem:[%s1110_s26 + $0xd0] sm:$0xff] }
  0x19   : > { %175 = vst [vmem:[%s134_s27 + $0x60] sm:$0xff] %v174_v12  ;;  %177 = vst [vmem:[%s134_s27 + $0x68] sm:$0xff] %v176_v13  ;;  %v180_v15 = vld [vmem:[%s1110_s26 + $0xd8] sm:$0xff] }
  0x1a   : > { %179 = vst [vmem:[%s134_s27 + $0x70] sm:$0xff] %v178_v14  ;;  %181 = vst [vmem:[%s134_s27 + $0x78] sm:$0xff] %v180_v15 }
  0x1b PF: > { %p924_p7 = scmp.ge.s32.totalorder %s1047_s14, 1  ;;  %p186_p8 = scmp.lt.s32.totalorder %s1047_s14, 3 }
  0x1d   : > { %p187_p9 = pnand %p924_p7, %p186_p8 }
  0x1e   : > { %s193_s28 = sand.u32 (!%p187_p9), 1, %s1039_s12  }
  0x1f   : > { %190 = sbr.rel (%p187_p9) target bundleno = 289 (0x121), region = 51  ;;  %s1131_s29 = sshll.u32 (!%p187_p9), %s193_s28, 7 }
  0x20   : > { %s1144_s7 = scalar_lea.vmem (!%p187_p9), [#allocation2], %s1131_s29  ;;  %s1233_s4 = scalar_lea.vmem (!%p187_p9), [#allocation3], %s1131_s29 }
  0x24   : > { %v1049_v16 = vmov 0   ;;  %v547_v17 = vld [vmem:[%s1334_s2] sm:$0xff]  ;;  %v549_v18 = vld [vmem:[%s1334_s2 + $0x10] sm:$0xff]  ;;  %v231_v21 = vld [vmem:[%s1144_s7 + $0x48] sm:$0xff]  ;;  %vm328_vm0 = vcmask 261120   ;;  %s995_s29 = sshll.u32 (%p1100_p5), %s917_s15, 5 }
  0x25   : > { %367 = vmatprep.mubr.bf16.mxu0 %v1049_v16  ;;  %420 = vmatprep.mubr.bf16.mxu1 %v1049_v16  ;;  %v230_v19 = vld [vmem:[%s1144_s7 + $0x40] sm:$0xff]  ;;  %v235_v23 = vld [vmem:[%s1144_s7 + $0x68] sm:$0xff]  ;;  %v232_v32 = vld [vmem:[%s1144_s7 + $0x50] sm:$0xff]  ;;  %s813_s20 = scalar_lea.vmem (%p1100_p5), %s1335_s3, %s995_s29 }
  0x26   : > { %1021 = vset.pattern.permute.xlu0 %v1049_v16  ;;  %1022 = vset.pattern.permute.xlu1 %v1049_v16  ;;  %v234_v20 = vld [vmem:[%s1144_s7 + $0x60] sm:$0xff]  ;;  %v940_v27 = vcombine.high %v231_v21, %v235_v23  ;;  %v939_v28 = vcombine.low %v231_v21, %v235_v23  ;;  %v223_v30 = vld [vmem:[%s1144_s7 + $0x8] sm:$0xff]  ;;  %v236_v34 = vld [vmem:[%s1144_s7 + $0x70] sm:$0xff] }
  0x27   : > { %553 = vperm.xlu0 %1021, %v547_v17   ;;  %563 = vperm.xlu1 %1022, %v549_v18   ;;  %v938_v22 = vcombine.high %v230_v19, %v234_v20  ;;  %v937_v24 = vcombine.low %v230_v19, %v234_v20  ;;  %v222_v25 = vld [vmem:[%s1144_s7] sm:$0xff]  ;;  %v227_v31 = vld [vmem:[%s1144_s7 + $0x28] sm:$0xff]  ;;  %v233_v35 = vld [vmem:[%s1144_s7 + $0x58] sm:$0xff]  ;;  %v942_v39 = vcombine.high %v232_v32, %v236_v34 }
  0x28   : > { %v226_v26 = vld [vmem:[%s1144_s7 + $0x20] sm:$0xff]  ;;  %v932_v33 = vcombine.high %v223_v30, %v227_v31  ;;  %v237_v36 = vld [vmem:[%s1144_s7 + $0x78] sm:$0xff]  ;;  %400 = vmatprep.subr.bf16.mxu1 %v940_v27  ;;  %v931_v38 = vcombine.low %v223_v30, %v227_v31  ;;  %v548_v40 = vld [vmem:[%s1334_s2 + $0x8] sm:$0xff]  ;;  %v941_v47 = vcombine.low %v232_v32, %v236_v34 }
  0x29   : > { %v930_v29 = vcombine.high %v222_v25, %v226_v26  ;;  %347 = vmatprep.subr.bf16.mxu0 %v938_v22  ;;  %v929_v37 = vcombine.low %v222_v25, %v226_v26  ;;  %401 = vmatpush1.bf16.msra.mxu1 %v939_v28  ;;  %v550_v41 = vld [vmem:[%s1334_s2 + $0x18] sm:$0xff]  ;;  %v1023_v42 = vld [vmem:[%s1333_s1] sm:$0xff]   ;;  %v944_v43 = vcombine.high %v233_v35, %v237_v36  ;;  %v224_v44 = vld [vmem:[%s1144_s7 + $0x10] sm:$0xff] }
  0x2a   : > { %348 = vmatpush1.bf16.msra.mxu0 %v937_v24  ;;  %402 = vmatprep.subr.bf16.mxu1 %v932_v33  ;;  %v228_v45 = vld [vmem:[%s1144_s7 + $0x30] sm:$0xff]  ;;  %v953_v46 = vld [vmem:[%s1334_s2 + $0x20] sm:$0xff]  ;;  %v225_v48 = vld [vmem:[%s1144_s7 + $0x18] sm:$0xff]  ;;  %v943_v51 = vcombine.low %v233_v35, %v237_v36 }
  0x2b   : > { %349 = vmatprep.subr.bf16.mxu0 %v930_v29  ;;  %558 = vperm.xlu0 %1021, %v548_v40   ;;  %v229_v49 = vld [vmem:[%s1144_s7 + $0x38] sm:$0xff]  ;;  %v954_v50 = vld [vmem:[%s1334_s2 + $0x28] sm:$0xff]  ;;  %v934_v52 = vcombine.high %v224_v44, %v228_v45  ;;  %v933_v54 = vcombine.low %v224_v44, %v228_v45  ;;  %v955_v55 = vld [vmem:[%s1334_s2 + $0x30] sm:$0xff] }
  0x2c   : > { %568 = vperm.xlu1 %1022, %v550_v41   ;;  %v936_v53 = vcombine.high %v225_v48, %v229_v49  ;;  %v935_v56 = vcombine.low %v225_v48, %v229_v49  ;;  %v956_v57 = vld [vmem:[%s1334_s2 + $0x38] sm:$0xff]  ;;  %v1024_v58 = vld [vmem:[%s1333_s1 + $0x8] sm:$0xff]  }
  0x2d   : > { %403 = vmatpush1.bf16.msra.mxu1 %v931_v38 }
  0x2e   : > { %350 = vmatpush1.bf16.msra.mxu0 %v929_v37  ;;  %506 = vmatprep.subr.bf16.mxu1 %v944_v43 }
  0x2f   : > { %453 = vmatprep.subr.bf16.mxu0 %v942_v39  ;;  %610 = vperm.xlu0 %1021, %v953_v46  }
  0x30   : > { %615 = vperm.xlu1 %1022, %v954_v50   ;;  %947 = vmatmul.mubr.msk.bf16.vlgmr.msra.gmra.mxu1 %vm328_vm0, %v1023_v42 }
  0x31   : > { %945 = vmatmul.mubr.msk.bf16.vlgmr.msra.gmra.mxu0 %vm328_vm0, %v1023_v42  ;;  %507 = vmatpush1.bf16.msra.mxu1 %v943_v51 }
  0x32   : > { %454 = vmatpush1.bf16.msra.mxu0 %v941_v47  ;;  %377 = vmatprep.mubr.bf16.mxu0 %v1049_v16 }
  0x33   : > { %430 = vmatprep.mubr.bf16.mxu1 %v1049_v16  ;;  %455 = vmatprep.subr.bf16.mxu0 %v934_v52 }
  0x34   : > { %508 = vmatprep.subr.bf16.mxu1 %v936_v53  ;;  %620 = vperm.xlu0 %1021, %v955_v55  }
  0x35   : > { %625 = vperm.xlu1 %1022, %v956_v57   ;;  %509 = vmatpush1.bf16.msra.mxu1 %v935_v56 }
  0x36   : > { %456 = vmatpush1.bf16.msra.mxu0 %v933_v54 }
  0x38   : > { %948 = vmatmul.mubr.msk.bf16.gmra.mxu1 %vm328_vm0, %v1024_v58 }
  0x39   : > { %946 = vmatmul.mubr.msk.bf16.gmra.mxu0 %vm328_vm0, %v1024_v58  ;;  %526 = vmatprep.mubr.bf16.mxu1 %v1049_v16 }
  0x3a   : > { %473 = vmatprep.mubr.bf16.mxu0 %v1049_v16 }
  0x40   : > { %951 = vmatmul.mubr.msk.bf16.vlgmr.msra.gmra.mxu1 %vm328_vm0, %v1023_v42 }
  0x41   : > { %949 = vmatmul.mubr.msk.bf16.vlgmr.msra.gmra.mxu0 %vm328_vm0, %v1023_v42  ;;  %536 = vmatprep.mubr.bf16.mxu1 %v1049_v16 }
  0x42   : > { %483 = vmatprep.mubr.bf16.mxu0 %v1049_v16 }
  0x48   : > { %952 = vmatmul.mubr.msk.bf16.gmra.mxu1 %vm328_vm0, %v1024_v58 }
  0x49   : > { %950 = vmatmul.mubr.msk.bf16.gmra.mxu0 %vm328_vm0, %v1024_v58 }
  0xa2   : > { %v1200_v59 = vpop.permute.xlu0 %553  ;;  %v1202_v60 = vpop.permute.xlu1 %563 }
  0xa6   : > { %v1204_v61 = vpop.permute.xlu0 %558 }
  0xa7   : > { %v1206_v62 = vpop.permute.xlu1 %568 }
  0xaa   : > { %v1208_v0 = vpop.permute.xlu0 %610 }
  0xab   : > { %v1216_v11 = vpop.permute.xlu1 %615 }
  0xaf   : > { %v1226_v28 = vpop.permute.xlu0 %620 }
  0xb0   : > { %v1241_v47 = vpop.permute.xlu1 %625 }
  0xf0   : > { %v422_v2 = vpop.f32.mrf.mxu1 }
  0xf1   : > { %v369_v63 = vpop.f32.mrf.mxu0  ;;  %v573_v3 = vmul.f32 %v1200_v59, %v422_v2 }
  0xf2   : > { %v571_v1 = vmul.f32 %v1200_v59, %v369_v63  ;;  %v424_v6 = vpop.f32.mrf.mxu1 }
  0xf3   : > { %v371_v4 = vpop.f32.mrf.mxu0  ;;  %v574_v8 = vmul.f32 %v1200_v59, %v424_v6  ;;  %v630_v9 = vadd.f32 %v1208_v0, %v573_v3 }
  0xf4   : > { %v572_v5 = vmul.f32 %v1200_v59, %v371_v4  ;;  %v628_v7 = vadd.f32 %v1208_v0, %v571_v1  ;;  %v426_v14 = vpop.f32.mrf.mxu1 }
  0xf5   : > { %v373_v10 = vpop.f32.mrf.mxu0  ;;  %v631_v15 = vadd.f32 %v1208_v0, %v574_v8  ;;  %v581_v16 = vmul.f32 %v1204_v61, %v426_v14  ;;  %v662_v23 = vmax.f32 %v630_v9, 0.0 }
  0xf6   : > { %v629_v12 = vadd.f32 %v1208_v0, %v572_v5  ;;  %v579_v13 = vmul.f32 %v1204_v61, %v373_v10  ;;  %v660_v18 = vmax.f32 %v628_v7, 0.0  ;;  %v428_v22 = vpop.f32.mrf.mxu1 }
  0xf7   : > { %v375_v17 = vpop.f32.mrf.mxu0  ;;  %v663_v24 = vmax.f32 %v631_v15, 0.0  ;;  %v582_v25 = vmul.f32 %v1204_v61, %v428_v22  ;;  %v638_v26 = vadd.f32 %v1216_v11, %v581_v16 }
  0xf8   : > { %v661_v19 = vmax.f32 %v629_v12, 0.0  ;;  %v580_v20 = vmul.f32 %v1204_v61, %v375_v17  ;;  %v636_v21 = vadd.f32 %v1216_v11, %v579_v13  ;;  %v432_v32 = vpop.f32.mrf.mxu1 }
  0xf9   : > { %v379_v27 = vpop.f32.mrf.mxu0  ;;  %v980_v33 = vpack.c.bf16 %v663_v24, %v662_v23  ;;  %v639_v34 = vadd.f32 %v1216_v11, %v582_v25  ;;  %v589_v35 = vmul.f32 %v1202_v60, %v432_v32  ;;  %v670_v42 = vmax.f32 %v638_v26, 0.0 }
  0xfa   : > { %v979_v29 = vpack.c.bf16 %v661_v19, %v660_v18  ;;  %v637_v30 = vadd.f32 %v1216_v11, %v580_v20  ;;  %v587_v31 = vmul.f32 %v1202_v60, %v379_v27  ;;  %v668_v37 = vmax.f32 %v636_v21, 0.0  ;;  %v434_v40 = vpop.f32.mrf.mxu1 }
  0xfb   : > { %v381_v36 = vpop.f32.mrf.mxu0  ;;  %789 = vst [vmem:[%s1233_s4 + $0x8] sm:$0xff] %v980_v33  ;;  %v671_v43 = vmax.f32 %v639_v34, 0.0  ;;  %v590_v44 = vmul.f32 %v1202_v60, %v434_v40  ;;  %v646_v45 = vadd.f32 %v1226_v28, %v589_v35 }
  0xfc   : > { %788 = vst [vmem:[%s1233_s4] sm:$0xff] %v979_v29  ;;  %v669_v38 = vmax.f32 %v637_v30, 0.0  ;;  %v588_v39 = vmul.f32 %v1202_v60, %v381_v36  ;;  %v644_v41 = vadd.f32 %v1226_v28, %v587_v31  ;;  %v436_v51 = vpop.f32.mrf.mxu1 }
  0xfd   : > { %v383_v46 = vpop.f32.mrf.mxu0  ;;  %v984_v52 = vpack.c.bf16 %v671_v43, %v670_v42  ;;  %v647_v53 = vadd.f32 %v1226_v28, %v590_v44  ;;  %v597_v54 = vmul.f32 %v1206_v62, %v436_v51  ;;  %v678_v2 = vmax.f32 %v646_v45, 0.0 }
  0xfe   : > { %v983_v48 = vpack.c.bf16 %v669_v38, %v668_v37  ;;  %v645_v49 = vadd.f32 %v1226_v28, %v588_v39  ;;  %v595_v50 = vmul.f32 %v1206_v62, %v383_v46  ;;  %v676_v56 = vmax.f32 %v644_v41, 0.0  ;;  %v438_v1 = vpop.f32.mrf.mxu1 }
  0xff   : > { %v385_v55 = vpop.f32.mrf.mxu0  ;;  %793 = vst [vmem:[%s1233_s4 + $0x28] sm:$0xff] %v984_v52  ;;  %v679_v3 = vmax.f32 %v647_v53, 0.0  ;;  %v598_v4 = vmul.f32 %v1206_v62, %v438_v1  ;;  %v654_v5 = vadd.f32 %v1241_v47, %v597_v54 }
 0x100   : > { %792 = vst [vmem:[%s1233_s4 + $0x20] sm:$0xff] %v983_v48  ;;  %v677_v57 = vmax.f32 %v645_v49, 0.0  ;;  %v596_v58 = vmul.f32 %v1206_v62, %v385_v55  ;;  %v652_v63 = vadd.f32 %v1241_v47, %v595_v50  ;;  %v528_v10 = vpop.f32.mrf.mxu1 }
 0x101   : > { %v475_v6 = vpop.f32.mrf.mxu0  ;;  %v988_v12 = vpack.c.bf16 %v679_v3, %v678_v2  ;;  %v655_v13 = vadd.f32 %v1241_v47, %v598_v4  ;;  %v577_v14 = vmul.f32 %v1200_v59, %v528_v10  ;;  %v686_v21 = vmax.f32 %v654_v5, 0.0 }
 0x102   : > { %v987_v7 = vpack.c.bf16 %v677_v57, %v676_v56  ;;  %v653_v8 = vadd.f32 %v1241_v47, %v596_v58  ;;  %v575_v9 = vmul.f32 %v1200_v59, %v475_v6  ;;  %v684_v16 = vmax.f32 %v652_v63, 0.0  ;;  %v530_v20 = vpop.f32.mrf.mxu1 }
 0x103   : > { %v477_v15 = vpop.f32.mrf.mxu0  ;;  %797 = vst [vmem:[%s1233_s4 + $0x48] sm:$0xff] %v988_v12  ;;  %v687_v22 = vmax.f32 %v655_v13, 0.0  ;;  %v634_v23 = vadd.f32 %v1208_v0, %v577_v14  ;;  %v578_v24 = vmul.f32 %v1200_v59, %v530_v20 }
 0x104   : > { %796 = vst [vmem:[%s1233_s4 + $0x40] sm:$0xff] %v987_v7  ;;  %v685_v17 = vmax.f32 %v653_v8, 0.0  ;;  %v632_v18 = vadd.f32 %v1208_v0, %v575_v9  ;;  %v576_v19 = vmul.f32 %v1200_v59, %v477_v15  ;;  %v532_v30 = vpop.f32.mrf.mxu1 }
 0x105   : > { %v479_v25 = vpop.f32.mrf.mxu0  ;;  %v992_v31 = vpack.c.bf16 %v687_v22, %v686_v21  ;;  %v635_v32 = vadd.f32 %v1208_v0, %v578_v24  ;;  %v585_v33 = vmul.f32 %v1204_v61, %v532_v30  ;;  %v666_v39 = vmax.f32 %v634_v23, 0.0 }
 0x106   : > { %v991_v26 = vpack.c.bf16 %v685_v17, %v684_v16  ;;  %v633_v27 = vadd.f32 %v1208_v0, %v576_v19  ;;  %v583_v29 = vmul.f32 %v1204_v61, %v479_v25  ;;  %v664_v35 = vmax.f32 %v632_v18, 0.0  ;;  %v534_v38 = vpop.f32.mrf.mxu1 }
 0x107   : > { %v481_v34 = vpop.f32.mrf.mxu0  ;;  %801 = vst [vmem:[%s1233_s4 + $0x68] sm:$0xff] %v992_v31  ;;  %v667_v40 = vmax.f32 %v635_v32, 0.0  ;;  %v642_v41 = vadd.f32 %v1216_v11, %v585_v33  ;;  %v586_v42 = vmul.f32 %v1204_v61, %v534_v38  ;;  %v834_v30 = vld [vmem:[%s1233_s4 + $0x20] sm:$0xff] (%p1100_p5)  ;;  %v836_v31 = vld [vmem:[%s1233_s4 + $0x28] sm:$0xff] (%p1100_p5) }
 0x108   : > { %800 = vst [vmem:[%s1233_s4 + $0x60] sm:$0xff] %v991_v26  ;;  %v665_v36 = vmax.f32 %v633_v27, 0.0  ;;  %v640_v37 = vadd.f32 %v1216_v11, %v583_v29  ;;  %v584_v59 = vmul.f32 %v1204_v61, %v481_v34  ;;  %v538_v46 = vpop.f32.mrf.mxu1  ;;  %835 = vst [vmem:[%s813_s20 + $0x40] sm:$0xff] (%p1100_p5), %v834_v30 }
 0x109   : > { %v485_v0 = vpop.f32.mrf.mxu0  ;;  %v982_v48 = vpack.c.bf16 %v667_v40, %v666_v39  ;;  %v643_v49 = vadd.f32 %v1216_v11, %v586_v42  ;;  %v593_v50 = vmul.f32 %v1202_v60, %v538_v46  ;;  %v674_v56 = vmax.f32 %v642_v41, 0.0  ;;  %837 = vst [vmem:[%s813_s20 + $0x48] sm:$0xff] (%p1100_p5), %v836_v31 }
 0x10a   : > { %v981_v43 = vpack.c.bf16 %v665_v36, %v664_v35  ;;  %v641_v44 = vadd.f32 %v1216_v11, %v584_v59  ;;  %v591_v45 = vmul.f32 %v1202_v60, %v485_v0  ;;  %v672_v52 = vmax.f32 %v640_v37, 0.0  ;;  %v540_v55 = vpop.f32.mrf.mxu1  ;;  %v844_v35 = vld [vmem:[%s1233_s4 + $0x48] sm:$0xff] (%p1100_p5) }
 0x10b   : > { %v487_v51 = vpop.f32.mrf.mxu0  ;;  %791 = vst [vmem:[%s1233_s4 + $0x18] sm:$0xff] %v982_v48  ;;  %v675_v57 = vmax.f32 %v643_v49, 0.0  ;;  %v650_v58 = vadd.f32 %v1226_v28, %v593_v50  ;;  %v594_v63 = vmul.f32 %v1202_v60, %v540_v55  ;;  %v842_v34 = vld [vmem:[%s1233_s4 + $0x40] sm:$0xff] (%p1100_p5)  ;;  %845 = vst [vmem:[%s813_s20 + $0x88] sm:$0xff] (%p1100_p5), %v844_v35 }
 0x10c   : > { %790 = vst [vmem:[%s1233_s4 + $0x10] sm:$0xff] %v981_v43  ;;  %v673_v53 = vmax.f32 %v641_v44, 0.0  ;;  %v648_v54 = vadd.f32 %v1226_v28, %v591_v45  ;;  %v592_v61 = vmul.f32 %v1202_v60, %v487_v51  ;;  %v542_v4 = vpop.f32.mrf.mxu1  ;;  %843 = vst [vmem:[%s813_s20 + $0x80] sm:$0xff] (%p1100_p5), %v842_v34 }
 0x10d   : > { %v489_v11 = vpop.f32.mrf.mxu0  ;;  %v986_v5 = vpack.c.bf16 %v675_v57, %v674_v56  ;;  %v651_v6 = vadd.f32 %v1226_v28, %v594_v63  ;;  %v601_v7 = vmul.f32 %v1206_v62, %v542_v4  ;;  %v682_v14 = vmax.f32 %v650_v58, 0.0 }
 0x10e   : > { %v985_v1 = vpack.c.bf16 %v673_v53, %v672_v52  ;;  %v649_v2 = vadd.f32 %v1226_v28, %v592_v61  ;;  %v599_v3 = vmul.f32 %v1206_v62, %v489_v11  ;;  %v680_v9 = vmax.f32 %v648_v54, 0.0  ;;  %v544_v13 = vpop.f32.mrf.mxu1  ;;  %v852_v38 = vld [vmem:[%s1233_s4 + $0x68] sm:$0xff] (%p1100_p5) }
 0x10f   : > { %v491_v8 = vpop.f32.mrf.mxu0  ;;  %795 = vst [vmem:[%s1233_s4 + $0x38] sm:$0xff] %v986_v5  ;;  %v683_v15 = vmax.f32 %v651_v6, 0.0  ;;  %v658_v28 = vadd.f32 %v1241_v47, %v601_v7  ;;  %v602_v16 = vmul.f32 %v1206_v62, %v544_v13  ;;  %v850_v59 = vld [vmem:[%s1233_s4 + $0x60] sm:$0xff] (%p1100_p5)  ;;  %853 = vst [vmem:[%s813_s20 + $0xc8] sm:$0xff] (%p1100_p5), %v852_v38 }
 0x110   : > { %794 = vst [vmem:[%s1233_s4 + $0x30] sm:$0xff] %v985_v1  ;;  %v681_v10 = vmax.f32 %v649_v2, 0.0  ;;  %v656_v60 = vadd.f32 %v1241_v47, %v599_v3  ;;  %v600_v12 = vmul.f32 %v1206_v62, %v491_v8  ;;  %v826_v62 = vld [vmem:[%s1233_s4] sm:$0xff] (%p1100_p5)  ;;  %851 = vst [vmem:[%s813_s20 + $0xc0] sm:$0xff] (%p1100_p5), %v850_v59 }
 0x111   : > { %v990_v19 = vpack.c.bf16 %v683_v15, %v682_v14  ;;  %v659_v20 = vadd.f32 %v1241_v47, %v602_v16  ;;  %v690_v23 = vmax.f32 %v658_v28, 0.0  ;;  %827 = vst [vmem:[%s813_s20] sm:$0xff] (%p1100_p5), %v826_v62 }
 0x112   : > { %v989_v17 = vpack.c.bf16 %v681_v10, %v680_v9  ;;  %v657_v18 = vadd.f32 %v1241_v47, %v600_v12  ;;  %v688_v21 = vmax.f32 %v656_v60, 0.0  ;;  %v828_v47 = vld [vmem:[%s1233_s4 + $0x8] sm:$0xff] (%p1100_p5)  ;;  %v832_v29 = vld [vmem:[%s1233_s4 + $0x18] sm:$0xff] (%p1100_p5) }
 0x113   : > { %799 = vst [vmem:[%s1233_s4 + $0x58] sm:$0xff] %v990_v19  ;;  %v691_v24 = vmax.f32 %v659_v20, 0.0  ;;  %v830_v27 = vld [vmem:[%s1233_s4 + $0x10] sm:$0xff] (%p1100_p5)  ;;  %829 = vst [vmem:[%s813_s20 + $0x8] sm:$0xff] (%p1100_p5), %v828_v47 }
 0x114   : > { %798 = vst [vmem:[%s1233_s4 + $0x50] sm:$0xff] %v989_v17  ;;  %v689_v22 = vmax.f32 %v657_v18, 0.0  ;;  %810 = sbr.rel (!%p1100_p5) target bundleno = 289 (0x121), region = 59  ;;  %831 = vst [vmem:[%s813_s20 + $0x10] sm:$0xff] (%p1100_p5), %v830_v27 }
 0x115   : > { %v994_v26 = vpack.c.bf16 %v691_v24, %v690_v23  ;;  %833 = vst [vmem:[%s813_s20 + $0x18] sm:$0xff] (%p1100_p5), %v832_v29 }
 0x116   : > { %v993_v25 = vpack.c.bf16 %v689_v22, %v688_v21  ;;  %v840_v33 = vld [vmem:[%s1233_s4 + $0x38] sm:$0xff] (%p1100_p5) }
 0x117   : > { %803 = vst [vmem:[%s1233_s4 + $0x78] sm:$0xff] %v994_v26  ;;  %v838_v32 = vld [vmem:[%s1233_s4 + $0x30] sm:$0xff] (%p1100_p5)  ;;  %841 = vst [vmem:[%s813_s20 + $0x58] sm:$0xff] (%p1100_p5), %v840_v33 }
 0x118   : > { %802 = vst [vmem:[%s1233_s4 + $0x70] sm:$0xff] %v993_v25  ;;  %839 = vst [vmem:[%s813_s20 + $0x50] sm:$0xff] (%p1100_p5), %v838_v32 }
 0x11a   : > { %v848_v37 = vld [vmem:[%s1233_s4 + $0x58] sm:$0xff] }
 0x11b   : > { %v846_v36 = vld [vmem:[%s1233_s4 + $0x50] sm:$0xff]  ;;  %849 = vst [vmem:[%s813_s20 + $0x98] sm:$0xff] %v848_v37 }
 0x11c   : > { %847 = vst [vmem:[%s813_s20 + $0x90] sm:$0xff] %v846_v36 }
 0x11e   : > { %v856_v40 = vld [vmem:[%s1233_s4 + $0x78] sm:$0xff] }
 0x11f   : > { %v854_v39 = vld [vmem:[%s1233_s4 + $0x70] sm:$0xff]  ;;  %857 = vst [vmem:[%s813_s20 + $0xd8] sm:$0xff] %v856_v40 }
 0x120   : > { %855 = vst [vmem:[%s813_s20 + $0xd0] sm:$0xff] %v854_v39 }
 0x121 PF: > { %p10_p10 = scmp.ge.s32.totalorder %s1087_s16, 4   ;;  %s1337_s12 = smov %s1043_s13 }
 0x122   : > { %s1338_s13 = smov %s1098_s19  ;;  %s1339_s14 = smov %s1087_s16 }
 0x123   :  { %12 = sbr.rel (!%p10_p10) target bundleno = 2 (0x2), region = 114 }

</bundles_post_ra>
